<compile_context>
chip_gen: v6e
topology: v6e:2x2x1
jax: 0.10.0
libtpu: 0.0.40
codegen_flags: <defaults>
</compile_context>

<pallas_src>
import functools

import jax
import jax.numpy as jnp
from jax.experimental import pallas as pl
from jax.experimental.pallas import tpu as pltpu

DROPOUT_RATE = 0.2
EMBED_SIZE = 384
HIDDEN_SIZE = 4 * EMBED_SIZE   # 1536
HIDDEN_CHUNK = 512             # caps the live hidden activation at (tm, 512)


def _round_up(a, b):
    return -(-a // b) * b


def ffn_kernel(seed_ref, x_ref, w1_ref, b1_ref, w2_ref, b2_ref, o_ref,
               *, training: bool, rate: float, hidden_chunk: int):
    # In-kernel bf16 cast: x stays f32 in HBM (single read), MXU sees bf16.
    x = x_ref[...].astype(jnp.bfloat16)
    tm = x.shape[0]
    hidden = w1_ref.shape[1]
    d_out = w2_ref.shape[1]
    n_chunks = hidden // hidden_chunk

    # Chunked hidden dim: bias + ReLU + bf16 downcast fused per chunk, then
    # accumulate through the MXU in f32.  Static Python unroll (3 chunks).
    acc = jnp.zeros((tm, d_out), jnp.float32)
    for c in range(n_chunks):
        c0 = c * hidden_chunk
        hk = jnp.dot(x, w1_ref[:, c0:c0 + hidden_chunk],
                     preferred_element_type=jnp.float32)
        hk = jnp.maximum(hk + b1_ref[:, c0:c0 + hidden_chunk],
                         0.0).astype(jnp.bfloat16)
        acc = acc + jnp.dot(hk, w2_ref[c0:c0 + hidden_chunk, :],
                            preferred_element_type=jnp.float32)

    y = acc + b2_ref[...]

    if training:
        # Inverted dropout with the hardware PRNG.  Trace-time branch: eval
        # mode pays nothing.  Per-tile seed mixed with a prime so (seed, tile)
        # pairs from adjacent calls don't collide.
        pltpu.prng_seed(seed_ref[0] + pl.program_id(0) * 7919)
        bits = pltpu.bitcast(pltpu.prng_random_bits(y.shape), jnp.uint32)
        thresh = jnp.uint32(int(rate * (2 ** 32)))
        keep = bits >= thresh
        y = jnp.where(keep, y * (1.0 / (1.0 - rate)), 0.0)
    # else: eval-mode dropout is the identity.

    o_ref[...] = y.astype(o_ref.dtype)


def _ffn_call(xm, w1, b1, w2, b2, seed_arr, *, training, tm):
    M, D = xm.shape
    H = w1.shape[1]
    kernel = functools.partial(ffn_kernel, training=training,
                               rate=DROPOUT_RATE, hidden_chunk=HIDDEN_CHUNK)

    return pl.pallas_call(
        kernel,
        out_shape=jax.ShapeDtypeStruct((M, D), jnp.float32),
        grid_spec=pltpu.PrefetchScalarGridSpec(
            num_scalar_prefetch=1,            # dropout seed lives in SMEM
            grid=(M // tm,),
            in_specs=[
                pl.BlockSpec((tm, D), lambda i, seed: (i, 0)),  # x row tile (f32)
                pl.BlockSpec((D, H), lambda i, seed: (0, 0)),   # W1 resident (bf16)
                pl.BlockSpec((1, H), lambda i, seed: (0, 0)),   # b1 (f32)
                pl.BlockSpec((H, D), lambda i, seed: (0, 0)),   # W2 resident (bf16)
                pl.BlockSpec((1, D), lambda i, seed: (0, 0)),   # b2 (f32)
            ],
            out_specs=pl.BlockSpec((tm, D), lambda i, seed: (i, 0)),
        ),
        compiler_params=pltpu.CompilerParams(
            dimension_semantics=("parallel",),   # row tiles shard across TCs
            vmem_limit_bytes=32 * 1024 * 1024,   # fits v5e/v6e/v7x budgets
        ),
    )(seed_arr, xm, w1, b1, w2, b2)


def position_wise_feed_forward(x, w1, b1, w2, b2, *, training=False, seed=0):
    """x: [B, S, 384] f32.  w1: [384, 1536], b1: [1, 1536], w2: [1536, 384], b2: [1, 384]."""
    B, S, D = x.shape
    M = B * S

    # Row-tile selection:
    #   * large M: tm up to 512 amortizes per-step pipeline overhead, clamped
    #     so the parallel grid keeps >= 2 steps (both v7x TensorCores busy).
    #   * small M: single full block, rounded up to 16 rows (bf16 sublane pack).
    if M >= 512:
        tm = min(512, _round_up(-(-M // 2), 256))
    elif M >= 256:
        tm = 256
    else:
        tm = max(16, _round_up(M, 16))
    M_pad = _round_up(M, tm)

    xm = x.reshape(M, D).astype(jnp.float32)
    if M_pad != M:
        xm = jnp.pad(xm, ((0, M_pad - M), (0, 0)))

    # bf16 matmul operands for the weights; biases stay f32 (added post-acc).
    w1b = w1.astype(jnp.bfloat16)
    w2b = w2.astype(jnp.bfloat16)
    b1f = b1.astype(jnp.float32).reshape(1, -1)
    b2f = b2.astype(jnp.float32).reshape(1, -1)
    seed_arr = jnp.asarray([seed], dtype=jnp.int32)

    out = _ffn_call(xm, w1b, b1f, w2b, b2f, seed_arr,
                    training=training, tm=tm)

    if M_pad != M:
        out = out[:M]
    return out.reshape(B, S, D)


def init_params(key):
    """Deterministic synthetic init matching nn.Linear's U(-1/sqrt(fan_in), +)."""
    k1, k2, k3, k4 = jax.random.split(key, 4)
    bound1 = 1.0 / (EMBED_SIZE ** 0.5)
    bound2 = 1.0 / (HIDDEN_SIZE ** 0.5)
    w1 = jax.random.uniform(k1, (EMBED_SIZE, HIDDEN_SIZE), jnp.float32,
                            -bound1, bound1)
    b1 = jax.random.uniform(k2, (1, HIDDEN_SIZE), jnp.float32, -bound1, bound1)
    w2 = jax.random.uniform(k3, (HIDDEN_SIZE, EMBED_SIZE), jnp.float32,
                            -bound2, bound2)
    b2 = jax.random.uniform(k4, (1, EMBED_SIZE), jnp.float32, -bound2, bound2)
    return w1, b1, w2, b2


if __name__ == "__main__":
    key = jax.random.PRNGKey(0)
    kx, kp = jax.random.split(key)

    # Small shapes consistent with the module: batch=2, seq=8, embed=384
    # (embed is fixed by the module definition).
    B, S = 2, 8
    x = jax.random.normal(kx, (B, S, EMBED_SIZE), jnp.float32)
    w1, b1, w2, b2 = init_params(kp)

    # Eval-mode forward (dropout = identity).  The training path applies
    # in-kernel inverted dropout with the hardware PRNG.
    out = position_wise_feed_forward(x, w1, b1, w2, b2, training=False)
    out = jax.block_until_ready(out)

    # Pure-JAX reference using the same bf16-operand / f32-accumulate math.
    xb = x.reshape(-1, EMBED_SIZE).astype(jnp.bfloat16)
    ref_h = jnp.maximum(
        jnp.dot(xb, w1.astype(jnp.bfloat16),
                preferred_element_type=jnp.float32) + b1, 0.0)
    ref = jnp.dot(ref_h.astype(jnp.bfloat16), w2.astype(jnp.bfloat16),
                  preferred_element_type=jnp.float32) + b2
    ref = ref.reshape(B, S, EMBED_SIZE)

    assert out.shape == (B, S, EMBED_SIZE)
    assert jnp.allclose(out, ref, atol=1e-2, rtol=1e-2), "mismatch vs reference"

    print("KERNEL_OK")
</pallas_src>

<mosaic_0001>
module attributes {stable_mosaic.version = 11 : i64} {
  func.func @ffn_kernel(%arg0: i32, %arg1: memref<1xi32, #tpu.memory_space<smem>>, %arg2: memref<16x384xf32, #tpu.memory_space<vmem>>, %arg3: memref<384x1536xbf16, #tpu.memory_space<vmem>>, %arg4: memref<1x1536xf32, #tpu.memory_space<vmem>>, %arg5: memref<1536x384xbf16, #tpu.memory_space<vmem>>, %arg6: memref<1x384xf32, #tpu.memory_space<vmem>>, %arg7: memref<16x384xf32, #tpu.memory_space<vmem>>) attributes {dimension_semantics = [#tpu.dimension_semantics<parallel>], iteration_bounds = array<i64: 1>, scalar_prefetch = 1 : i64, scratch_operands = 0 : i64, tpu.core_type = #tpu.core_type<tc>, window_params = [{transform_indices = @transform_0, window_bounds = array<i64: 16, 384>}, {pipeline_mode = #tpu.pipeline_mode<synchronous>, transform_indices = @transform_1, window_bounds = array<i64: 384, 1536>}, {pipeline_mode = #tpu.pipeline_mode<synchronous>, transform_indices = @transform_2, window_bounds = array<i64: 1, 1536>}, {pipeline_mode = #tpu.pipeline_mode<synchronous>, transform_indices = @transform_3, window_bounds = array<i64: 1536, 384>}, {pipeline_mode = #tpu.pipeline_mode<synchronous>, transform_indices = @transform_4, window_bounds = array<i64: 1, 384>}, {transform_indices = @transform_5, window_bounds = array<i64: 16, 384>}]} {
    %c0 = arith.constant 0 : index
    %c0_0 = arith.constant 0 : index
    %0 = vector.load %arg2[%c0, %c0_0] : memref<16x384xf32, #tpu.memory_space<vmem>>, vector<16x384xf32>
    %1 = arith.truncf %0 : vector<16x384xf32> to vector<16x384xbf16>
    %cst = arith.constant 0.000000e+00 : f32
    %2 = vector.broadcast %cst : f32 to vector<16x384xf32>
    %c0_1 = arith.constant 0 : index
    %c0_2 = arith.constant 0 : index
    %3 = vector.load %arg3[%c0_1, %c0_2] : memref<384x1536xbf16, #tpu.memory_space<vmem>>, vector<384x512xbf16>
    %cst_3 = arith.constant dense<0.000000e+00> : vector<16x512xf32>
    %4 = tpu.matmul %1, %3, %cst_3 {dimension_numbers = #tpu.dot_dimension_numbers<[1], [0], [0], [1], [0, 0, 1, 1], [], []>} : vector<16x384xbf16>, vector<384x512xbf16>, vector<16x512xf32> -> vector<16x512xf32>
    %c0_4 = arith.constant 0 : index
    %c0_5 = arith.constant 0 : index
    %5 = vector.load %arg4[%c0_4, %c0_5] : memref<1x1536xf32, #tpu.memory_space<vmem>>, vector<1x512xf32>
    %6 = vector.broadcast %5 : vector<1x512xf32> to vector<16x512xf32>
    %7 = arith.addf %4, %6 : vector<16x512xf32>
    %cst_6 = arith.constant 0.000000e+00 : f32
    %8 = vector.broadcast %cst_6 : f32 to vector<16x512xf32>
    %9 = arith.maximumf %7, %8 : vector<16x512xf32>
    %10 = arith.truncf %9 : vector<16x512xf32> to vector<16x512xbf16>
    %c0_7 = arith.constant 0 : index
    %c0_8 = arith.constant 0 : index
    %11 = vector.load %arg5[%c0_7, %c0_8] : memref<1536x384xbf16, #tpu.memory_space<vmem>>, vector<512x384xbf16>
    %cst_9 = arith.constant dense<0.000000e+00> : vector<16x384xf32>
    %12 = tpu.matmul %10, %11, %cst_9 {dimension_numbers = #tpu.dot_dimension_numbers<[1], [0], [0], [1], [0, 0, 1, 1], [], []>} : vector<16x512xbf16>, vector<512x384xbf16>, vector<16x384xf32> -> vector<16x384xf32>
    %13 = arith.addf %2, %12 : vector<16x384xf32>
    %c0_10 = arith.constant 0 : index
    %c512 = arith.constant 512 : index
    %14 = vector.load %arg3[%c0_10, %c512] : memref<384x1536xbf16, #tpu.memory_space<vmem>>, vector<384x512xbf16>
    %cst_11 = arith.constant dense<0.000000e+00> : vector<16x512xf32>
    %15 = tpu.matmul %1, %14, %cst_11 {dimension_numbers = #tpu.dot_dimension_numbers<[1], [0], [0], [1], [0, 0, 1, 1], [], []>} : vector<16x384xbf16>, vector<384x512xbf16>, vector<16x512xf32> -> vector<16x512xf32>
    %c0_12 = arith.constant 0 : index
    %c512_13 = arith.constant 512 : index
    %16 = vector.load %arg4[%c0_12, %c512_13] : memref<1x1536xf32, #tpu.memory_space<vmem>>, vector<1x512xf32>
    %17 = vector.broadcast %16 : vector<1x512xf32> to vector<16x512xf32>
    %18 = arith.addf %15, %17 : vector<16x512xf32>
    %cst_14 = arith.constant 0.000000e+00 : f32
    %19 = vector.broadcast %cst_14 : f32 to vector<16x512xf32>
    %20 = arith.maximumf %18, %19 : vector<16x512xf32>
    %21 = arith.truncf %20 : vector<16x512xf32> to vector<16x512xbf16>
    %c512_15 = arith.constant 512 : index
    %c0_16 = arith.constant 0 : index
    %22 = vector.load %arg5[%c512_15, %c0_16] : memref<1536x384xbf16, #tpu.memory_space<vmem>>, vector<512x384xbf16>
    %cst_17 = arith.constant dense<0.000000e+00> : vector<16x384xf32>
    %23 = tpu.matmul %21, %22, %cst_17 {dimension_numbers = #tpu.dot_dimension_numbers<[1], [0], [0], [1], [0, 0, 1, 1], [], []>} : vector<16x512xbf16>, vector<512x384xbf16>, vector<16x384xf32> -> vector<16x384xf32>
    %24 = arith.addf %13, %23 : vector<16x384xf32>
    %c0_18 = arith.constant 0 : index
    %c1024 = arith.constant 1024 : index
    %25 = vector.load %arg3[%c0_18, %c1024] : memref<384x1536xbf16, #tpu.memory_space<vmem>>, vector<384x512xbf16>
    %cst_19 = arith.constant dense<0.000000e+00> : vector<16x512xf32>
    %26 = tpu.matmul %1, %25, %cst_19 {dimension_numbers = #tpu.dot_dimension_numbers<[1], [0], [0], [1], [0, 0, 1, 1], [], []>} : vector<16x384xbf16>, vector<384x512xbf16>, vector<16x512xf32> -> vector<16x512xf32>
    %c0_20 = arith.constant 0 : index
    %c1024_21 = arith.constant 1024 : index
    %27 = vector.load %arg4[%c0_20, %c1024_21] : memref<1x1536xf32, #tpu.memory_space<vmem>>, vector<1x512xf32>
    %28 = vector.broadcast %27 : vector<1x512xf32> to vector<16x512xf32>
    %29 = arith.addf %26, %28 : vector<16x512xf32>
    %cst_22 = arith.constant 0.000000e+00 : f32
    %30 = vector.broadcast %cst_22 : f32 to vector<16x512xf32>
    %31 = arith.maximumf %29, %30 : vector<16x512xf32>
    %32 = arith.truncf %31 : vector<16x512xf32> to vector<16x512xbf16>
    %c1024_23 = arith.constant 1024 : index
    %c0_24 = arith.constant 0 : index
    %33 = vector.load %arg5[%c1024_23, %c0_24] : memref<1536x384xbf16, #tpu.memory_space<vmem>>, vector<512x384xbf16>
    %cst_25 = arith.constant dense<0.000000e+00> : vector<16x384xf32>
    %34 = tpu.matmul %32, %33, %cst_25 {dimension_numbers = #tpu.dot_dimension_numbers<[1], [0], [0], [1], [0, 0, 1, 1], [], []>} : vector<16x512xbf16>, vector<512x384xbf16>, vector<16x384xf32> -> vector<16x384xf32>
    %35 = arith.addf %24, %34 : vector<16x384xf32>
    %c0_26 = arith.constant 0 : index
    %c0_27 = arith.constant 0 : index
    %36 = vector.load %arg6[%c0_26, %c0_27] : memref<1x384xf32, #tpu.memory_space<vmem>>, vector<1x384xf32>
    %37 = vector.broadcast %36 : vector<1x384xf32> to vector<16x384xf32>
    %38 = arith.addf %35, %37 : vector<16x384xf32>
    %c0_28 = arith.constant 0 : index
    %c0_29 = arith.constant 0 : index
    %39 = vector.load %arg7[%c0_28, %c0_29] : memref<16x384xf32, #tpu.memory_space<vmem>>, vector<16x384xf32>
    tpu.vector_store %arg7[%c0_28, %c0_29], %38 {strides = array<i32>} : memref<16x384xf32, #tpu.memory_space<vmem>>, vector<16x384xf32>,
    return
  }
  func.func @transform_0(%arg0: i32, %arg1: memref<1xi32, #tpu.memory_space<smem>>) -> (i32, i32) {
    %c0_i32 = arith.constant 0 : i32
    %c0_i32_0 = arith.constant 0 : i32
    return %arg0, %c0_i32 : i32, i32
  }
  func.func @transform_1(%arg0: i32, %arg1: memref<1xi32, #tpu.memory_space<smem>>) -> (i32, i32) {
    %c0_i32 = arith.constant 0 : i32
    %c0_i32_0 = arith.constant 0 : i32
    %c0_i32_1 = arith.constant 0 : i32
    return %c0_i32, %c0_i32_0 : i32, i32
  }
  func.func @transform_2(%arg0: i32, %arg1: memref<1xi32, #tpu.memory_space<smem>>) -> (i32, i32) {
    %c0_i32 = arith.constant 0 : i32
    %c0_i32_0 = arith.constant 0 : i32
    %c0_i32_1 = arith.constant 0 : i32
    return %c0_i32, %c0_i32_0 : i32, i32
  }
  func.func @transform_3(%arg0: i32, %arg1: memref<1xi32, #tpu.memory_space<smem>>) -> (i32, i32) {
    %c0_i32 = arith.constant 0 : i32
    %c0_i32_0 = arith.constant 0 : i32
    %c0_i32_1 = arith.constant 0 : i32
    return %c0_i32, %c0_i32_0 : i32, i32
  }
  func.func @transform_4(%arg0: i32, %arg1: memref<1xi32, #tpu.memory_space<smem>>) -> (i32, i32) {
    %c0_i32 = arith.constant 0 : i32
    %c0_i32_0 = arith.constant 0 : i32
    %c0_i32_1 = arith.constant 0 : i32
    return %c0_i32, %c0_i32_0 : i32, i32
  }
  func.func @transform_5(%arg0: i32, %arg1: memref<1xi32, #tpu.memory_space<smem>>) -> (i32, i32) {
    %c0_i32 = arith.constant 0 : i32
    %c0_i32_0 = arith.constant 0 : i32
    return %arg0, %c0_i32 : i32, i32
  }
}

</mosaic_0001>

<bundles_post_ra>
// kernel: tpu_custom_call.1
= control target key start
LH: loop header
LB: loop body
LE: loop exit
PB: predicated region body
PF: predicated region fallthrough
CT: control target
= control target key end

     0   :  { %12 = vsyncpa [#allocation5], 0  ;;  %s6801_s0 = inlined_call_operand.<no memory space> [shape: s32[1], index: 0, kind: input, shape index: {}]   ;;  %s6802_s1 = inlined_call_operand.hbm [shape: f32[16,384], index: 1, kind: input, shape index: {}]   ;;  %s6803_s2 = inlined_call_operand.hbm [shape: bf16[384,1536], index: 2, kind: input, shape index: {}]   ;;  %s6804_s3 = inlined_call_operand.hbm [shape: f32[1,1536], index: 3, kind: input, shape index: {}]   ;;  %s6805_s4 = inlined_call_operand.hbm [shape: bf16[1536,384], index: 4, kind: input, shape index: {}]   ;;  %s6806_s5 = inlined_call_operand.hbm [shape: f32[1,384], index: 5, kind: input, shape index: {}]   ;;  %s6807_s6 = inlined_call_operand.hbm [shape: f32[16,384], index: 6, kind: output, shape index: {}]  }
   0x1   :  { %13 = vsyncpa [#allocation8], 0 }
   0x2   :  { %14 = vsyncpa [#allocation11], 0 }
   0x3   :  { %15 = vsyncpa [#allocation6], 0  ;;  %s6586_s0 = smov [#allocation7]  }
   0x4   :  { %s33_s21 = sshll.u32 %s6586_s0, 4  ;;  %s34_s21 = int_to_ptr.vmem [resolvable:$true] %s33_s21 }
   0x5   :  { %s6466_s22 = scalar_lea.vmem %s34_s21, 36864  ;;  %p6471_p1 = scmp.lt.s32.totalorder %s34_s21, %s34_s21 }
   0x6   :  { %p6467_p0 = scmp.ne.s32.totalorder %s34_s21, %s6466_s22  ;;  %p6472_p2 = scmp.lt.s32.totalorder %s6466_s22, %s6466_s22 }
   0x8   :  { %p6473_p3 = por %p6472_p2, %p6471_p1 }
   0xa   :  { %p6474_p4 = pnand %p6473_p3, %p6467_p0 }
   0xc   :  { %6477 = shalt.err (!%p6474_p4)
}
   0xd   :  { %s6587_s23 = smov 768   ;;  %s6588_s24 = smov 48  }
   0xe   :  { %39 = dma.hbm_to_vmem [thread:$0]  %s6803_s2, 36864, %s34_s21, [#allocation8], %s6587_s23, %s6587_s23, %s6588_s24  }
   0xf   :  { %s6589_s27 = smov [#allocation10]  }
  0x10   :  { %s55_s28 = sshll.u32 %s6589_s27, 4  ;;  %s56_s28 = int_to_ptr.vmem [resolvable:$true] %s55_s28 }
  0x11   :  { %s6486_s29 = scalar_lea.vmem %s56_s28, 36864  ;;  %p6491_p6 = scmp.lt.s32.totalorder %s56_s28, %s56_s28 }
  0x12   :  { %p6487_p5 = scmp.ne.s32.totalorder %s56_s28, %s6486_s29  ;;  %p6492_p7 = scmp.lt.s32.totalorder %s6486_s29, %s6486_s29 }
  0x14   :  { %p6493_p8 = por %p6492_p7, %p6491_p6 }
  0x16   :  { %p6494_p9 = pnand %p6493_p8, %p6487_p5 }
  0x18   :  { %6497 = shalt.err (!%p6494_p9)
}
  0x19   :  { %s6590_s30 = smov 192   ;;  %s6591_s7 = smov 12  }
  0x1a   :  { %61 = dma.hbm_to_vmem [thread:$0]  %s6805_s4, 36864, %s56_s28, [#allocation11], %s6590_s30, %s6590_s30, %s6591_s7  }
  0x1b   :  { %s6592_s10 = smov [#allocation4]  }
  0x1c   :  { %s21_s11 = sshll.u32 %s6592_s10, 4  ;;  %s22_s11 = int_to_ptr.vmem [resolvable:$true] %s21_s11 }
  0x1d   :  { %s6506_s2 = scalar_lea.vmem %s22_s11, 768  ;;  %p6511_p11 = scmp.lt.s32.totalorder %s22_s11, %s22_s11 }
  0x1e   :  { %p6507_p10 = scmp.ne.s32.totalorder %s22_s11, %s6506_s2  ;;  %p6512_p12 = scmp.lt.s32.totalorder %s6506_s2, %s6506_s2 }
  0x20   :  { %p6513_p13 = por %p6512_p12, %p6511_p11 }
  0x22   :  { %p6514_p0 = pnand %p6513_p13, %p6507_p10 }
  0x24   :  { %6517 = shalt.err (!%p6514_p0)
}
  0x25   :  { %s6593_s12 = smov 384   ;;  %s6594_s13 = smov 24  }
  0x26   :  { %27 = dma.hbm_to_vmem [thread:$0]  %s6802_s1, 768, %s22_s11, [#allocation5], %s6593_s12, %s6593_s12, %s6594_s13  }
  0x27   :  { %s6595_s4 = smov [#allocation9]   ;;  %s6596_s17 = smov [#allocation12]  }
  0x28   :  { %s46_s16 = sshll.u32 %s6595_s4, 4  ;;  %s68_s18 = sshll.u32 %s6596_s17, 4  ;;  %s47_s16 = int_to_ptr.vmem [resolvable:$true] %s46_s16  ;;  %s69_s18 = int_to_ptr.vmem [resolvable:$true] %s68_s18 }
  0x29   :  { %s6526_s19 = scalar_lea.vmem %s47_s16, 192  ;;  %p6531_p2 = scmp.lt.s32.totalorder %s47_s16, %s47_s16 }
  0x2a   :  { %p6527_p1 = scmp.ne.s32.totalorder %s47_s16, %s6526_s19  ;;  %p6532_p3 = scmp.lt.s32.totalorder %s6526_s19, %s6526_s19 }
  0x2c   :  { %p6533_p4 = por %p6532_p3, %p6531_p2 }
  0x2e   :  { %p6534_p5 = pnand %p6533_p4, %p6527_p1 }
  0x30   :  { %6537 = shalt.err (!%p6534_p5)
}
  0x31   :  { %49 = dma.hbm_to_vmem [thread:$0]  %s6804_s3, 192, %s47_s16, [#allocation8]  }
  0x32   :  { %s6546_s21 = scalar_lea.vmem %s69_s18, 48  ;;  %s6550_s1 = scalar_lea.vmem %s69_s18, 64 }
  0x33   :  { %p6547_p6 = scmp.ne.s32.totalorder %s69_s18, %s6546_s21  ;;  %p6551_p7 = scmp.lt.s32.totalorder %s69_s18, %s69_s18 }
  0x34   :  { %p6552_p8 = scmp.lt.s32.totalorder %s6550_s1, %s6546_s21 }
  0x36   :  { %p6553_p9 = por %p6552_p8, %p6551_p7 }
  0x38   :  { %p6554_p10 = pnand %p6553_p9, %p6547_p6 }
  0x3a   :  { %6557 = shalt.err (!%p6554_p10)
}
  0x3b   :  { %71 = dma.hbm_to_vmem [thread:$0]  %s6806_s5, 48, %s69_s18, [#allocation11]  }
  0x3c   :  { %6578 = dma.done.wait [#allocation5], 768  }
  0x3d   :  { %6579 = vsyncadd [#allocation5], 4294966528 }
  0x3e   :  { %6580 = dma.done.wait [#allocation8], 37056  }
  0x3f   :  { %6581 = vsyncadd [#allocation8], 4294930240 }
  0x40   :  { %6582 = dma.done.wait [#allocation11], 36912  }
  0x41   :  { %6583 = vsyncadd [#allocation11], 4294930384  ;;  %v6597_v0 = vmov 0   ;;  %v5642_v1 = vld [vmem:[#allocation7 + $0x2a4] ss:$48 sps:$4 sm:$0xff]   ;;  %v93_v34 = vld [vmem:[#allocation4 + $0x28] sm:$0xff] }
  0x42   :  { %770 = vmatprep.mubr.bf16.mxu1 %v6597_v0  ;;  %v5644_v2 = vld [vmem:[#allocation7 + $0x8a4] ss:$48 sps:$4 sm:$0xff]   ;;  %695 = vmatprep.subr.bf16.mxu0 %v5642_v1  ;;  %v5646_v3 = vld [vmem:[#allocation7 + $0x2a0] ss:$48 sps:$4 sm:$0xff]   ;;  %v5694_v36 = vld [vmem:[#allocation7 + $0x2ac] ss:$48 sps:$4 sm:$0xff]  }
  0x43   :  { %v5647_v4 = vld [vmem:[#allocation7 + $0x8a0] ss:$48 sps:$4 sm:$0xff]   ;;  %738 = vmatprep.subr.bf16.mxu1 %v5644_v2  ;;  %v5648_v5 = vld [vmem:[#allocation7 + $0x244] ss:$48 sps:$4 sm:$0xff]   ;;  %696 = vmatpush1.bf16.msra.mxu0 %v5646_v3  ;;  %v5692_v38 = vld [vmem:[#allocation7 + $0x2a8] ss:$48 sps:$4 sm:$0xff]  }
  0x44   :  { %739 = vmatpush1.bf16.msra.mxu1 %v5647_v4  ;;  %v5650_v6 = vld [vmem:[#allocation7 + $0x844] ss:$48 sps:$4 sm:$0xff]   ;;  %v5652_v7 = vld [vmem:[#allocation7 + $0x240] ss:$48 sps:$4 sm:$0xff]   ;;  %697 = vmatprep.subr.bf16.mxu0 %v5648_v5  ;;  %v5700_v41 = vld [vmem:[#allocation7 + $0x24c] ss:$48 sps:$4 sm:$0xff]  }
  0x45   :  { %v5653_v8 = vld [vmem:[#allocation7 + $0x840] ss:$48 sps:$4 sm:$0xff]   ;;  %740 = vmatprep.subr.bf16.mxu1 %v5650_v6  ;;  %v5654_v9 = vld [vmem:[#allocation7 + $0x1e4] ss:$48 sps:$4 sm:$0xff]   ;;  %v5698_v42 = vld [vmem:[#allocation7 + $0x248] ss:$48 sps:$4 sm:$0xff]  }
  0x46   :  { %v5656_v10 = vld [vmem:[#allocation7 + $0x7e4] ss:$48 sps:$4 sm:$0xff]   ;;  %v5658_v11 = vld [vmem:[#allocation7 + $0x1e0] ss:$48 sps:$4 sm:$0xff]   ;;  %v5706_v45 = vld [vmem:[#allocation7 + $0x1ec] ss:$48 sps:$4 sm:$0xff]  }
  0x47   :  { %v5659_v12 = vld [vmem:[#allocation7 + $0x7e0] ss:$48 sps:$4 sm:$0xff]   ;;  %698 = vmatpush1.bf16.msra.mxu0 %v5652_v7  ;;  %v5660_v13 = vld [vmem:[#allocation7 + $0x184] ss:$48 sps:$4 sm:$0xff]   ;;  %v5704_v46 = vld [vmem:[#allocation7 + $0x1e8] ss:$48 sps:$4 sm:$0xff]  }
  0x48   :  { %741 = vmatpush1.bf16.msra.mxu1 %v5653_v8  ;;  %699 = vmatprep.subr.bf16.mxu0 %v5654_v9  ;;  %v5662_v14 = vld [vmem:[#allocation7 + $0x784] ss:$48 sps:$4 sm:$0xff]   ;;  %v5664_v15 = vld [vmem:[#allocation7 + $0x180] ss:$48 sps:$4 sm:$0xff]   ;;  %v5712_v49 = vld [vmem:[#allocation7 + $0x18c] ss:$48 sps:$4 sm:$0xff]  }
  0x49   :  { %742 = vmatprep.subr.bf16.mxu1 %v5656_v10  ;;  %v5665_v16 = vld [vmem:[#allocation7 + $0x780] ss:$48 sps:$4 sm:$0xff]   ;;  %v5666_v17 = vld [vmem:[#allocation7 + $0x124] ss:$48 sps:$4 sm:$0xff]   ;;  %v89_v50 = vld [vmem:[#allocation4 + $0x8] sm:$0xff]  ;;  %s6598_s3 = smov [#allocation13]  }
  0x4a   :  { %v5668_v18 = vld [vmem:[#allocation7 + $0x724] ss:$48 sps:$4 sm:$0xff]   ;;  %v5670_v19 = vld [vmem:[#allocation7 + $0x120] ss:$48 sps:$4 sm:$0xff]   ;;  %v5710_v52 = vld [vmem:[#allocation7 + $0x188] ss:$48 sps:$4 sm:$0xff]  }
  0x4b   :  { %700 = vmatpush1.bf16.msra.mxu0 %v5658_v11  ;;  %v5671_v20 = vld [vmem:[#allocation7 + $0x720] ss:$48 sps:$4 sm:$0xff]   ;;  %v5672_v21 = vld [vmem:[#allocation7 + $0xc4] ss:$48 sps:$4 sm:$0xff]   ;;  %v5718_v56 = vld [vmem:[#allocation7 + $0x12c] ss:$48 sps:$4 sm:$0xff]  }
  0x4c   :  { %743 = vmatpush1.bf16.msra.mxu1 %v5659_v12  ;;  %701 = vmatprep.subr.bf16.mxu0 %v5660_v13  ;;  %v5674_v22 = vld [vmem:[#allocation7 + $0x6c4] ss:$48 sps:$4 sm:$0xff]   ;;  %v5676_v23 = vld [vmem:[#allocation7 + $0xc0] ss:$48 sps:$4 sm:$0xff]   ;;  %v5716_v57 = vld [vmem:[#allocation7 + $0x128] ss:$48 sps:$4 sm:$0xff]  }
  0x4d   :  { %744 = vmatprep.subr.bf16.mxu1 %v5662_v14  ;;  %v5677_v24 = vld [vmem:[#allocation7 + $0x6c0] ss:$48 sps:$4 sm:$0xff]   ;;  %v5678_v25 = vld [vmem:[#allocation7 + $0x64] ss:$48 sps:$4 sm:$0xff]   ;;  %v5724_v60 = vld [vmem:[#allocation7 + $0xcc] ss:$48 sps:$4 sm:$0xff]  }
  0x4e   :  { %v5680_v26 = vld [vmem:[#allocation7 + $0x664] ss:$48 sps:$4 sm:$0xff]   ;;  %v5682_v27 = vld [vmem:[#allocation7 + $0x60] ss:$48 sps:$4 sm:$0xff]   ;;  %v5722_v61 = vld [vmem:[#allocation7 + $0xc8] ss:$48 sps:$4 sm:$0xff]  }
  0x4f   :  { %702 = vmatpush1.bf16.msra.mxu0 %v5664_v15  ;;  %v5683_v28 = vld [vmem:[#allocation7 + $0x660] ss:$48 sps:$4 sm:$0xff]   ;;  %v5684_v29 = vld [vmem:[#allocation7 + $0x4] ss:$48 sps:$4 sm:$0xff]   ;;  %v5730_v1 = vld [vmem:[#allocation7 + $0x6c] ss:$48 sps:$4 sm:$0xff]  }
  0x50   :  { %745 = vmatpush1.bf16.msra.mxu1 %v5665_v16  ;;  %703 = vmatprep.subr.bf16.mxu0 %v5666_v17  ;;  %v5686_v30 = vld [vmem:[#allocation7 + $0x604] ss:$48 sps:$4 sm:$0xff]   ;;  %v5688_v31 = vld [vmem:[#allocation7] ss:$48 sps:$4 sm:$0xff]   ;;  %v5728_v2 = vld [vmem:[#allocation7 + $0x68] ss:$48 sps:$4 sm:$0xff]  }
  0x51   :  { %746 = vmatprep.subr.bf16.mxu1 %v5668_v18  ;;  %v5689_v32 = vld [vmem:[#allocation7 + $0x600] ss:$48 sps:$4 sm:$0xff]   ;;  %v5690_v35 = vld [vmem:[#allocation7 + $0x5a4] ss:$48 sps:$4 sm:$0xff]   ;;  %v5736_v5 = vld [vmem:[#allocation7 + $0xc] ss:$48 sps:$4 sm:$0xff]  }
  0x52   :  { %v90_v33 = vld [vmem:[#allocation4 + $0x10] sm:$0xff]  ;;  %v92_v51 = vld [vmem:[#allocation4 + $0x20] sm:$0xff]  ;;  %v5734_v6 = vld [vmem:[#allocation7 + $0x8] ss:$48 sps:$4 sm:$0xff]   ;;  %s4907_s5 = sshll.u32 %s6598_s3, 4  ;;  %s4908_s5 = int_to_ptr.vmem [resolvable:$true] %s4907_s5 }
  0x53   :  { %704 = vmatpush1.bf16.msra.mxu0 %v5670_v19  ;;  %v6653_v37 = vpack.c.bf16 %v93_v34, %v90_v33  ;;  %v5695_v39 = vld [vmem:[#allocation7 + $0x5a0] ss:$48 sps:$4 sm:$0xff]   ;;  %v5696_v40 = vld [vmem:[#allocation7 + $0x544] ss:$48 sps:$4 sm:$0xff]   ;;  %v6656_v54 = vpack.c.bf16 %v92_v51, %v89_v50  ;;  %v91_v9 = vld [vmem:[#allocation4 + $0x18] sm:$0xff]  ;;  %s6558_s24 = scalar_lea.vmem %s4908_s5, 768  ;;  %p6563_p12 = scmp.lt.s32.totalorder %s4908_s5, %s4908_s5 }
  0x54   :  { %747 = vmatpush1.bf16.msra.mxu1 %v5671_v20  ;;  %705 = vmatprep.subr.bf16.mxu0 %v5672_v21  ;;  %v5701_v43 = vld [vmem:[#allocation7 + $0x540] ss:$48 sps:$4 sm:$0xff]   ;;  %v5702_v44 = vld [vmem:[#allocation7 + $0x4e4] ss:$48 sps:$4 sm:$0xff]   ;;  %v5740_v10 = vld [vmem:[#allocation7 + $0x5ac] ss:$48 sps:$4 sm:$0xff]   ;;  %p6559_p11 = scmp.ne.s32.totalorder %s4908_s5, %s6558_s24  ;;  %p6564_p13 = scmp.lt.s32.totalorder %s6558_s24, %s6558_s24 }
  0x55   :  { %748 = vmatprep.subr.bf16.mxu1 %v5674_v22  ;;  %v5707_v47 = vld [vmem:[#allocation7 + $0x4e0] ss:$48 sps:$4 sm:$0xff]   ;;  %v5708_v48 = vld [vmem:[#allocation7 + $0x484] ss:$48 sps:$4 sm:$0xff]   ;;  %727 = vmatprep.mubr.bf16.mxu0 %v6656_v54  ;;  %v5743_v11 = vld [vmem:[#allocation7 + $0x8ac] ss:$48 sps:$4 sm:$0xff]  }
  0x56   :  { %v5713_v53 = vld [vmem:[#allocation7 + $0x480] ss:$48 sps:$4 sm:$0xff]   ;;  %v5714_v55 = vld [vmem:[#allocation7 + $0x424] ss:$48 sps:$4 sm:$0xff]   ;;  %v5738_v13 = vld [vmem:[#allocation7 + $0x5a8] ss:$48 sps:$4 sm:$0xff]   ;;  %p6565_p0 = por %p6564_p13, %p6563_p12 }
  0x57   :  { %706 = vmatpush1.bf16.msra.mxu0 %v5676_v23  ;;  %v5719_v58 = vld [vmem:[#allocation7 + $0x420] ss:$48 sps:$4 sm:$0xff]   ;;  %v5720_v59 = vld [vmem:[#allocation7 + $0x3c4] ss:$48 sps:$4 sm:$0xff]   ;;  %v5741_v14 = vld [vmem:[#allocation7 + $0x8a8] ss:$48 sps:$4 sm:$0xff]  }
  0x58   :  { %749 = vmatpush1.bf16.msra.mxu1 %v5677_v24  ;;  %707 = vmatprep.subr.bf16.mxu0 %v5678_v25  ;;  %v5725_v62 = vld [vmem:[#allocation7 + $0x3c0] ss:$48 sps:$4 sm:$0xff]   ;;  %v5726_v63 = vld [vmem:[#allocation7 + $0x364] ss:$48 sps:$4 sm:$0xff]   ;;  %v5746_v15 = vld [vmem:[#allocation7 + $0x54c] ss:$48 sps:$4 sm:$0xff]   ;;  %p6566_p1 = pnand %p6565_p0, %p6559_p11 }
  0x59   :  { %750 = vmatprep.subr.bf16.mxu1 %v5680_v26  ;;  %v5731_v3 = vld [vmem:[#allocation7 + $0x360] ss:$48 sps:$4 sm:$0xff]   ;;  %v5732_v4 = vld [vmem:[#allocation7 + $0x304] ss:$48 sps:$4 sm:$0xff]   ;;  %v5749_v16 = vld [vmem:[#allocation7 + $0x84c] ss:$48 sps:$4 sm:$0xff]  }
  0x5a   :  { %v5737_v7 = vld [vmem:[#allocation7 + $0x300] ss:$48 sps:$4 sm:$0xff]   ;;  %v5744_v17 = vld [vmem:[#allocation7 + $0x548] ss:$48 sps:$4 sm:$0xff]   ;;  %v5752_v19 = vld [vmem:[#allocation7 + $0x4ec] ss:$48 sps:$4 sm:$0xff]  }
  0x5b   :  { %708 = vmatpush1.bf16.msra.mxu0 %v5682_v27  ;;  %v88_v8 = vld [vmem:[#allocation4] sm:$0xff]  ;;  %v5747_v18 = vld [vmem:[#allocation7 + $0x848] ss:$48 sps:$4 sm:$0xff]   ;;  %v5755_v20 = vld [vmem:[#allocation7 + $0x7ec] ss:$48 sps:$4 sm:$0xff]  }
  0x5c   :  { %751 = vmatpush1.bf16.msra.mxu1 %v5683_v28  ;;  %709 = vmatprep.subr.bf16.mxu0 %v5684_v29  ;;  %v6660_v12 = vpack.c.bf16 %v91_v9, %v88_v8  ;;  %v5750_v21 = vld [vmem:[#allocation7 + $0x4e8] ss:$48 sps:$4 sm:$0xff]   ;;  %v5758_v23 = vld [vmem:[#allocation7 + $0x48c] ss:$48 sps:$4 sm:$0xff]   ;;  %v5792_v50 = vld [vmem:[#allocation7 + $0x250] ss:$48 sps:$4 sm:$0xff]  }
  0x5d   :  { %752 = vmatprep.subr.bf16.mxu1 %v5686_v30  ;;  %v5753_v22 = vld [vmem:[#allocation7 + $0x7e8] ss:$48 sps:$4 sm:$0xff]   ;;  %v5761_v24 = vld [vmem:[#allocation7 + $0x78c] ss:$48 sps:$4 sm:$0xff]   ;;  %v5795_v51 = vld [vmem:[#allocation7 + $0x850] ss:$48 sps:$4 sm:$0xff]  }
  0x5e   :  { %v5756_v25 = vld [vmem:[#allocation7 + $0x488] ss:$48 sps:$4 sm:$0xff]   ;;  %v5764_v27 = vld [vmem:[#allocation7 + $0x42c] ss:$48 sps:$4 sm:$0xff]   ;;  %v5822_v8 = vld [vmem:[#allocation7 + $0x70] ss:$48 sps:$4 sm:$0xff]  }
  0x5f   :  { %710 = vmatpush1.bf16.msra.mxu0 %v5688_v31  ;;  %v5759_v26 = vld [vmem:[#allocation7 + $0x788] ss:$48 sps:$4 sm:$0xff]   ;;  %v5767_v28 = vld [vmem:[#allocation7 + $0x72c] ss:$48 sps:$4 sm:$0xff]   ;;  %v5825_v9 = vld [vmem:[#allocation7 + $0x670] ss:$48 sps:$4 sm:$0xff]  }
  0x60   :  { %753 = vmatpush1.bf16.msra.mxu1 %v5689_v32  ;;  %711 = vmatprep.subr.bf16.mxu0 %v5690_v35  ;;  %v5762_v29 = vld [vmem:[#allocation7 + $0x428] ss:$48 sps:$4 sm:$0xff]   ;;  %v5770_v31 = vld [vmem:[#allocation7 + $0x3cc] ss:$48 sps:$4 sm:$0xff]  }
  0x61   :  { %781 = vmatprep.subr.bf16.mxu1 %v5694_v36  ;;  %v5765_v30 = vld [vmem:[#allocation7 + $0x728] ss:$48 sps:$4 sm:$0xff]   ;;  %v5773_v32 = vld [vmem:[#allocation7 + $0x6cc] ss:$48 sps:$4 sm:$0xff]  }
  0x62   :  { %v5768_v33 = vld [vmem:[#allocation7 + $0x3c8] ss:$48 sps:$4 sm:$0xff]   ;;  %v5776_v35 = vld [vmem:[#allocation7 + $0x36c] ss:$48 sps:$4 sm:$0xff]  }
  0x63   :  { %771 = vmatmul.mubr.bf16.vlgmr.msra.gmra.mxu1 %v6653_v37  ;;  %712 = vmatpush2.bf16.msra.mxu0 %v5695_v39  ;;  %v5771_v34 = vld [vmem:[#allocation7 + $0x6c8] ss:$48 sps:$4 sm:$0xff]   ;;  %v5779_v36 = vld [vmem:[#allocation7 + $0x66c] ss:$48 sps:$4 sm:$0xff]  }
  0x64   :  { %782 = vmatpush1.bf16.msra.mxu1 %v5692_v38  ;;  %713 = vmatprep.subr.bf16.mxu0 %v5696_v40  ;;  %v5774_v38 = vld [vmem:[#allocation7 + $0x368] ss:$48 sps:$4 sm:$0xff]   ;;  %v5782_v40 = vld [vmem:[#allocation7 + $0x30c] ss:$48 sps:$4 sm:$0xff]  }
  0x65   :  { %783 = vmatprep.subr.bf16.mxu1 %v5700_v41  ;;  %813 = vmatprep.mubr.bf16.mxu1 %v6656_v54  ;;  %v5777_v39 = vld [vmem:[#allocation7 + $0x668] ss:$48 sps:$4 sm:$0xff]   ;;  %v5785_v41 = vld [vmem:[#allocation7 + $0x60c] ss:$48 sps:$4 sm:$0xff]  }
  0x67   :  { %714 = vmatpush2.bf16.msra.mxu0 %v5701_v43  ;;  %v5783_v43 = vld [vmem:[#allocation7 + $0x608] ss:$48 sps:$4 sm:$0xff]  }
  0x68   :  { %784 = vmatpush1.bf16.msra.mxu1 %v5698_v42  ;;  %715 = vmatprep.subr.bf16.mxu0 %v5702_v44  ;;  %v5780_v42 = vld [vmem:[#allocation7 + $0x308] ss:$48 sps:$4 sm:$0xff]   ;;  %v5788_v44 = vld [vmem:[#allocation7 + $0x2b4] ss:$48 sps:$4 sm:$0xff]  }
  0x69   :  { %785 = vmatprep.subr.bf16.mxu1 %v5706_v45  ;;  %v5791_v45 = vld [vmem:[#allocation7 + $0x8b4] ss:$48 sps:$4 sm:$0xff]  }
  0x6b   :  { %716 = vmatpush2.bf16.msra.mxu0 %v5707_v47  ;;  %v5789_v47 = vld [vmem:[#allocation7 + $0x8b0] ss:$48 sps:$4 sm:$0xff]  }
  0x6c   :  { %786 = vmatpush1.bf16.msra.mxu1 %v5704_v46  ;;  %717 = vmatprep.subr.bf16.mxu0 %v5708_v48  ;;  %v5786_v46 = vld [vmem:[#allocation7 + $0x2b0] ss:$48 sps:$4 sm:$0xff]   ;;  %v5794_v48 = vld [vmem:[#allocation7 + $0x254] ss:$48 sps:$4 sm:$0xff]  }
  0x6d   :  { %787 = vmatprep.subr.bf16.mxu1 %v5712_v49  ;;  %v5797_v49 = vld [vmem:[#allocation7 + $0x854] ss:$48 sps:$4 sm:$0xff]  }
  0x6f   :  { %718 = vmatpush2.bf16.msra.mxu0 %v5713_v53  ;;  %v5803_v53 = vld [vmem:[#allocation7 + $0x7f4] ss:$48 sps:$4 sm:$0xff]  }
  0x70   :  { %788 = vmatpush1.bf16.msra.mxu1 %v5710_v52  ;;  %719 = vmatprep.subr.bf16.mxu0 %v5714_v55  ;;  %v5800_v52 = vld [vmem:[#allocation7 + $0x1f4] ss:$48 sps:$4 sm:$0xff]   ;;  %v5798_v55 = vld [vmem:[#allocation7 + $0x1f0] ss:$48 sps:$4 sm:$0xff]  }
  0x71   :  { %789 = vmatprep.subr.bf16.mxu1 %v5718_v56  ;;  %v5801_v56 = vld [vmem:[#allocation7 + $0x7f0] ss:$48 sps:$4 sm:$0xff]  }
  0x73   :  { %720 = vmatpush2.bf16.msra.mxu0 %v5719_v58  ;;  %v5809_v58 = vld [vmem:[#allocation7 + $0x794] ss:$48 sps:$4 sm:$0xff]  }
  0x74   :  { %790 = vmatpush1.bf16.msra.mxu1 %v5716_v57  ;;  %721 = vmatprep.subr.bf16.mxu0 %v5720_v59  ;;  %v5806_v57 = vld [vmem:[#allocation7 + $0x194] ss:$48 sps:$4 sm:$0xff]   ;;  %v5804_v59 = vld [vmem:[#allocation7 + $0x190] ss:$48 sps:$4 sm:$0xff]  }
  0x75   :  { %791 = vmatprep.subr.bf16.mxu1 %v5724_v60  ;;  %v5807_v60 = vld [vmem:[#allocation7 + $0x790] ss:$48 sps:$4 sm:$0xff]  }
  0x77   :  { %722 = vmatpush2.bf16.msra.mxu0 %v5725_v62  ;;  %v5815_v62 = vld [vmem:[#allocation7 + $0x734] ss:$48 sps:$4 sm:$0xff]  }
  0x78   :  { %792 = vmatpush1.bf16.msra.mxu1 %v5722_v61  ;;  %723 = vmatprep.subr.bf16.mxu0 %v5726_v63  ;;  %v5812_v61 = vld [vmem:[#allocation7 + $0x134] ss:$48 sps:$4 sm:$0xff]   ;;  %v5810_v63 = vld [vmem:[#allocation7 + $0x130] ss:$48 sps:$4 sm:$0xff]  }
  0x79   :  { %793 = vmatprep.subr.bf16.mxu1 %v5730_v1  ;;  %v5813_v1 = vld [vmem:[#allocation7 + $0x730] ss:$48 sps:$4 sm:$0xff]  }
  0x7b   :  { %724 = vmatpush2.bf16.msra.mxu0 %v5731_v3  ;;  %v5821_v3 = vld [vmem:[#allocation7 + $0x6d4] ss:$48 sps:$4 sm:$0xff]  }
  0x7c   :  { %794 = vmatpush1.bf16.msra.mxu1 %v5728_v2  ;;  %725 = vmatprep.subr.bf16.mxu0 %v5732_v4  ;;  %v5818_v2 = vld [vmem:[#allocation7 + $0xd4] ss:$48 sps:$4 sm:$0xff]   ;;  %v5816_v4 = vld [vmem:[#allocation7 + $0xd0] ss:$48 sps:$4 sm:$0xff]  }
  0x7d   :  { %795 = vmatprep.subr.bf16.mxu1 %v5736_v5  ;;  %v5819_v5 = vld [vmem:[#allocation7 + $0x6d0] ss:$48 sps:$4 sm:$0xff]  }
  0x7f   :  { %726 = vmatpush2.bf16.msra.mxu0 %v5737_v7  ;;  %v5827_v7 = vld [vmem:[#allocation7 + $0x674] ss:$48 sps:$4 sm:$0xff]  }
  0x80   :  { %796 = vmatpush1.bf16.msra.mxu1 %v5734_v6  ;;  %824 = vmatprep.subr.bf16.mxu0 %v5743_v11  ;;  %v5824_v6 = vld [vmem:[#allocation7 + $0x74] ss:$48 sps:$4 sm:$0xff]  }
  0x81   :  { %797 = vmatprep.subr.bf16.mxu1 %v5740_v10  ;;  %v5830_v10 = vld [vmem:[#allocation7 + $0x14] ss:$48 sps:$4 sm:$0xff]  }
  0x82   :  { %728 = vmatmul.mubr.bf16.vlgmr.msra.gmra.mxu0 %v6660_v12  ;;  %v5833_v11 = vld [vmem:[#allocation7 + $0x614] ss:$48 sps:$4 sm:$0xff]  }
  0x83   :  { %825 = vmatpush1.bf16.msra.mxu0 %v5741_v14  ;;  %856 = vmatprep.mubr.bf16.mxu0 %v6597_v0  ;;  %v5831_v14 = vld [vmem:[#allocation7 + $0x610] ss:$48 sps:$4 sm:$0xff]  }
  0x84   :  { %798 = vmatpush2.bf16.msra.mxu1 %v5738_v13  ;;  %826 = vmatprep.subr.bf16.mxu0 %v5749_v16  ;;  %v5828_v13 = vld [vmem:[#allocation7 + $0x10] ss:$48 sps:$4 sm:$0xff]   ;;  %v5839_v16 = vld [vmem:[#allocation7 + $0x2bc] ss:$48 sps:$4 sm:$0xff]  }
  0x85   :  { %799 = vmatprep.subr.bf16.mxu1 %v5746_v15  ;;  %v5836_v15 = vld [vmem:[#allocation7 + $0x5b4] ss:$48 sps:$4 sm:$0xff]  }
  0x87   :  { %827 = vmatpush1.bf16.msra.mxu0 %v5747_v18  ;;  %v5837_v18 = vld [vmem:[#allocation7 + $0x2b8] ss:$48 sps:$4 sm:$0xff]  }
  0x88   :  { %800 = vmatpush2.bf16.msra.mxu1 %v5744_v17  ;;  %828 = vmatprep.subr.bf16.mxu0 %v5755_v20  ;;  %v5834_v17 = vld [vmem:[#allocation7 + $0x5b0] ss:$48 sps:$4 sm:$0xff]   ;;  %v5845_v20 = vld [vmem:[#allocation7 + $0x25c] ss:$48 sps:$4 sm:$0xff]  }
  0x89   :  { %801 = vmatprep.subr.bf16.mxu1 %v5752_v19  ;;  %v5842_v19 = vld [vmem:[#allocation7 + $0x554] ss:$48 sps:$4 sm:$0xff]  }
  0x8b   :  { %829 = vmatpush1.bf16.msra.mxu0 %v5753_v22  ;;  %v5843_v22 = vld [vmem:[#allocation7 + $0x258] ss:$48 sps:$4 sm:$0xff]  }
  0x8c   :  { %802 = vmatpush2.bf16.msra.mxu1 %v5750_v21  ;;  %830 = vmatprep.subr.bf16.mxu0 %v5761_v24  ;;  %v5840_v21 = vld [vmem:[#allocation7 + $0x550] ss:$48 sps:$4 sm:$0xff]   ;;  %v5851_v24 = vld [vmem:[#allocation7 + $0x1fc] ss:$48 sps:$4 sm:$0xff]  }
  0x8d   :  { %803 = vmatprep.subr.bf16.mxu1 %v5758_v23  ;;  %v5848_v23 = vld [vmem:[#allocation7 + $0x4f4] ss:$48 sps:$4 sm:$0xff]  }
  0x8f   :  { %831 = vmatpush1.bf16.msra.mxu0 %v5759_v26  ;;  %v5849_v26 = vld [vmem:[#allocation7 + $0x1f8] ss:$48 sps:$4 sm:$0xff]  }
  0x90   :  { %804 = vmatpush2.bf16.msra.mxu1 %v5756_v25  ;;  %832 = vmatprep.subr.bf16.mxu0 %v5767_v28  ;;  %v5846_v25 = vld [vmem:[#allocation7 + $0x4f0] ss:$48 sps:$4 sm:$0xff]   ;;  %v5857_v28 = vld [vmem:[#allocation7 + $0x19c] ss:$48 sps:$4 sm:$0xff]  }
  0x91   :  { %805 = vmatprep.subr.bf16.mxu1 %v5764_v27  ;;  %v5854_v27 = vld [vmem:[#allocation7 + $0x494] ss:$48 sps:$4 sm:$0xff]  }
  0x93   :  { %833 = vmatpush1.bf16.msra.mxu0 %v5765_v30  ;;  %v5855_v30 = vld [vmem:[#allocation7 + $0x198] ss:$48 sps:$4 sm:$0xff]  }
  0x94   :  { %806 = vmatpush2.bf16.msra.mxu1 %v5762_v29  ;;  %834 = vmatprep.subr.bf16.mxu0 %v5773_v32  ;;  %v5852_v29 = vld [vmem:[#allocation7 + $0x490] ss:$48 sps:$4 sm:$0xff]   ;;  %v5863_v32 = vld [vmem:[#allocation7 + $0x13c] ss:$48 sps:$4 sm:$0xff]  }
  0x95   :  { %807 = vmatprep.subr.bf16.mxu1 %v5770_v31  ;;  %v5860_v31 = vld [vmem:[#allocation7 + $0x434] ss:$48 sps:$4 sm:$0xff]  }
  0x97   :  { %835 = vmatpush1.bf16.msra.mxu0 %v5771_v34  ;;  %v5861_v34 = vld [vmem:[#allocation7 + $0x138] ss:$48 sps:$4 sm:$0xff]  }
  0x98   :  { %808 = vmatpush2.bf16.msra.mxu1 %v5768_v33  ;;  %836 = vmatprep.subr.bf16.mxu0 %v5779_v36  ;;  %v5858_v33 = vld [vmem:[#allocation7 + $0x430] ss:$48 sps:$4 sm:$0xff]   ;;  %v5869_v36 = vld [vmem:[#allocation7 + $0xdc] ss:$48 sps:$4 sm:$0xff]  }
  0x99   :  { %809 = vmatprep.subr.bf16.mxu1 %v5776_v35  ;;  %v5866_v35 = vld [vmem:[#allocation7 + $0x3d4] ss:$48 sps:$4 sm:$0xff]  }
  0x9b   :  { %837 = vmatpush1.bf16.msra.mxu0 %v5777_v39  ;;  %v5867_v39 = vld [vmem:[#allocation7 + $0xd8] ss:$48 sps:$4 sm:$0xff]  }
  0x9c   :  { %810 = vmatpush2.bf16.msra.mxu1 %v5774_v38  ;;  %838 = vmatprep.subr.bf16.mxu0 %v5785_v41  ;;  %v5864_v38 = vld [vmem:[#allocation7 + $0x3d0] ss:$48 sps:$4 sm:$0xff]   ;;  %v5875_v41 = vld [vmem:[#allocation7 + $0x7c] ss:$48 sps:$4 sm:$0xff]  }
  0x9d   :  { %811 = vmatprep.subr.bf16.mxu1 %v5782_v40  ;;  %v5872_v40 = vld [vmem:[#allocation7 + $0x374] ss:$48 sps:$4 sm:$0xff]  }
  0x9f   :  { %839 = vmatpush1.bf16.msra.mxu0 %v5783_v43  ;;  %v5873_v43 = vld [vmem:[#allocation7 + $0x78] ss:$48 sps:$4 sm:$0xff]  }
  0xa0   :  { %812 = vmatpush2.bf16.msra.mxu1 %v5780_v42  ;;  %1605 = vmatprep.subr.bf16.mxu0 %v5788_v44  ;;  %v5870_v42 = vld [vmem:[#allocation7 + $0x370] ss:$48 sps:$4 sm:$0xff]   ;;  %v5878_v44 = vld [vmem:[#allocation7 + $0x314] ss:$48 sps:$4 sm:$0xff]  }
  0xa1   :  { %1648 = vmatprep.subr.bf16.mxu1 %v5791_v45  ;;  %v5881_v45 = vld [vmem:[#allocation7 + $0x1c] ss:$48 sps:$4 sm:$0xff]  }
  0xa2   :  { %857 = vmatmul.mubr.bf16.vlgmr.msra.gmra.mxu0 %v6653_v37 }
  0xa3   :  { %814 = vmatmul.mubr.bf16.vlgmr.msra.gmra.mxu1 %v6660_v12  ;;  %1606 = vmatpush1.bf16.msra.mxu0 %v5786_v46  ;;  %v5876_v46 = vld [vmem:[#allocation7 + $0x310] ss:$48 sps:$4 sm:$0xff]  }
  0xa4   :  { %1649 = vmatpush1.bf16.msra.mxu1 %v5789_v47  ;;  %1607 = vmatprep.subr.bf16.mxu0 %v5794_v48  ;;  %v5879_v47 = vld [vmem:[#allocation7 + $0x18] ss:$48 sps:$4 sm:$0xff]   ;;  %v5884_v48 = vld [vmem:[#allocation7 + $0x5bc] ss:$48 sps:$4 sm:$0xff]  }
  0xa5   :  { %1650 = vmatprep.subr.bf16.mxu1 %v5797_v49  ;;  %1680 = vmatprep.mubr.bf16.mxu1 %v6597_v0  ;;  %v5887_v49 = vld [vmem:[#allocation7 + $0x8bc] ss:$48 sps:$4 sm:$0xff]  }
  0xa6   :  { %1637 = vmatprep.mubr.bf16.mxu0 %v6656_v54 }
  0xa7   :  { %1608 = vmatpush1.bf16.msra.mxu0 %v5792_v50  ;;  %v5882_v50 = vld [vmem:[#allocation7 + $0x5b8] ss:$48 sps:$4 sm:$0xff]  }
  0xa8   :  { %1651 = vmatpush1.bf16.msra.mxu1 %v5795_v51  ;;  %1609 = vmatprep.subr.bf16.mxu0 %v5800_v52  ;;  %v5885_v51 = vld [vmem:[#allocation7 + $0x8b8] ss:$48 sps:$4 sm:$0xff]   ;;  %v5890_v52 = vld [vmem:[#allocation7 + $0x55c] ss:$48 sps:$4 sm:$0xff]  }
  0xa9   :  { %1652 = vmatprep.subr.bf16.mxu1 %v5803_v53  ;;  %v5893_v53 = vld [vmem:[#allocation7 + $0x85c] ss:$48 sps:$4 sm:$0xff]  }
  0xab   :  { %1610 = vmatpush1.bf16.msra.mxu0 %v5798_v55  ;;  %v5888_v55 = vld [vmem:[#allocation7 + $0x558] ss:$48 sps:$4 sm:$0xff]  }
  0xac   :  { %1653 = vmatpush1.bf16.msra.mxu1 %v5801_v56  ;;  %1611 = vmatprep.subr.bf16.mxu0 %v5806_v57  ;;  %v5891_v56 = vld [vmem:[#allocation7 + $0x858] ss:$48 sps:$4 sm:$0xff]   ;;  %v5896_v57 = vld [vmem:[#allocation7 + $0x4fc] ss:$48 sps:$4 sm:$0xff]  }
  0xad   :  { %1654 = vmatprep.subr.bf16.mxu1 %v5809_v58  ;;  %v5899_v58 = vld [vmem:[#allocation7 + $0x7fc] ss:$48 sps:$4 sm:$0xff]  }
  0xaf   :  { %1612 = vmatpush1.bf16.msra.mxu0 %v5804_v59  ;;  %v5894_v59 = vld [vmem:[#allocation7 + $0x4f8] ss:$48 sps:$4 sm:$0xff]  }
  0xb0   :  { %1655 = vmatpush1.bf16.msra.mxu1 %v5807_v60  ;;  %1613 = vmatprep.subr.bf16.mxu0 %v5812_v61  ;;  %v5897_v60 = vld [vmem:[#allocation7 + $0x7f8] ss:$48 sps:$4 sm:$0xff]   ;;  %v5902_v61 = vld [vmem:[#allocation7 + $0x49c] ss:$48 sps:$4 sm:$0xff]  }
  0xb1   :  { %1656 = vmatprep.subr.bf16.mxu1 %v5815_v62  ;;  %v5905_v62 = vld [vmem:[#allocation7 + $0x79c] ss:$48 sps:$4 sm:$0xff]  }
  0xb3   :  { %1614 = vmatpush1.bf16.msra.mxu0 %v5810_v63  ;;  %v5900_v63 = vld [vmem:[#allocation7 + $0x498] ss:$48 sps:$4 sm:$0xff]  }
  0xb4   :  { %1657 = vmatpush1.bf16.msra.mxu1 %v5813_v1  ;;  %1615 = vmatprep.subr.bf16.mxu0 %v5818_v2  ;;  %v5903_v1 = vld [vmem:[#allocation7 + $0x798] ss:$48 sps:$4 sm:$0xff]   ;;  %v5908_v2 = vld [vmem:[#allocation7 + $0x43c] ss:$48 sps:$4 sm:$0xff]  }
  0xb5   :  { %1658 = vmatprep.subr.bf16.mxu1 %v5821_v3  ;;  %v5911_v3 = vld [vmem:[#allocation7 + $0x73c] ss:$48 sps:$4 sm:$0xff]  }
  0xb7   :  { %1616 = vmatpush1.bf16.msra.mxu0 %v5816_v4  ;;  %v5906_v4 = vld [vmem:[#allocation7 + $0x438] ss:$48 sps:$4 sm:$0xff]  }
  0xb8   :  { %1659 = vmatpush1.bf16.msra.mxu1 %v5819_v5  ;;  %1617 = vmatprep.subr.bf16.mxu0 %v5824_v6  ;;  %v5909_v5 = vld [vmem:[#allocation7 + $0x738] ss:$48 sps:$4 sm:$0xff]   ;;  %v5914_v6 = vld [vmem:[#allocation7 + $0x3dc] ss:$48 sps:$4 sm:$0xff]  }
  0xb9   :  { %1660 = vmatprep.subr.bf16.mxu1 %v5827_v7  ;;  %v5917_v7 = vld [vmem:[#allocation7 + $0x6dc] ss:$48 sps:$4 sm:$0xff]  }
  0xbb   :  { %1618 = vmatpush1.bf16.msra.mxu0 %v5822_v8  ;;  %v5912_v8 = vld [vmem:[#allocation7 + $0x3d8] ss:$48 sps:$4 sm:$0xff]  }
  0xbc   :  { %1661 = vmatpush1.bf16.msra.mxu1 %v5825_v9  ;;  %1619 = vmatprep.subr.bf16.mxu0 %v5830_v10  ;;  %v5915_v9 = vld [vmem:[#allocation7 + $0x6d8] ss:$48 sps:$4 sm:$0xff]   ;;  %v5920_v10 = vld [vmem:[#allocation7 + $0x37c] ss:$48 sps:$4 sm:$0xff]  }
  0xbd   :  { %1662 = vmatprep.subr.bf16.mxu1 %v5833_v11  ;;  %v5923_v11 = vld [vmem:[#allocation7 + $0x67c] ss:$48 sps:$4 sm:$0xff]  }
  0xbf   :  { %1620 = vmatpush1.bf16.msra.mxu0 %v5828_v13  ;;  %v5918_v13 = vld [vmem:[#allocation7 + $0x378] ss:$48 sps:$4 sm:$0xff]  }
  0xc0   :  { %1663 = vmatpush1.bf16.msra.mxu1 %v5831_v14  ;;  %1621 = vmatprep.subr.bf16.mxu0 %v5836_v15  ;;  %v5921_v14 = vld [vmem:[#allocation7 + $0x678] ss:$48 sps:$4 sm:$0xff]   ;;  %v5926_v15 = vld [vmem:[#allocation7 + $0x31c] ss:$48 sps:$4 sm:$0xff]  }
  0xc1   :  { %1691 = vmatprep.subr.bf16.mxu1 %v5839_v16  ;;  %v5929_v16 = vld [vmem:[#allocation7 + $0x61c] ss:$48 sps:$4 sm:$0xff]  }
  0xc3   :  { %1681 = vmatmul.mubr.bf16.vlgmr.msra.gmra.mxu1 %v6653_v37  ;;  %1622 = vmatpush2.bf16.msra.mxu0 %v5834_v17  ;;  %v5924_v17 = vld [vmem:[#allocation7 + $0x318] ss:$48 sps:$4 sm:$0xff]  }
  0xc4   :  { %1692 = vmatpush1.bf16.msra.mxu1 %v5837_v18  ;;  %1623 = vmatprep.subr.bf16.mxu0 %v5842_v19  ;;  %v5927_v18 = vld [vmem:[#allocation7 + $0x618] ss:$48 sps:$4 sm:$0xff]  }
  0xc5   :  { %1693 = vmatprep.subr.bf16.mxu1 %v5845_v20  ;;  %1723 = vmatprep.mubr.bf16.mxu1 %v6656_v54  ;;  %v5932_v19 = vld [vmem:[#allocation10 + $0x3ac] ss:$12 sps:$4 sm:$0xff]   ;;  %v5930_v20 = vld [vmem:[#allocation10 + $0x3a8] ss:$12 sps:$4 sm:$0xff]  }
  0xc7   :  { %1624 = vmatpush2.bf16.msra.mxu0 %v5840_v21  ;;  %v5935_v21 = vld [vmem:[#allocation10 + $0x394] ss:$12 sps:$4 sm:$0xff]  }
  0xc8   :  { %1694 = vmatpush1.bf16.msra.mxu1 %v5843_v22  ;;  %1625 = vmatprep.subr.bf16.mxu0 %v5848_v23  ;;  %v5933_v22 = vld [vmem:[#allocation10 + $0x390] ss:$12 sps:$4 sm:$0xff]  }
  0xc9   :  { %1695 = vmatprep.subr.bf16.mxu1 %v5851_v24  ;;  %v5938_v23 = vld [vmem:[#allocation10 + $0x37c] ss:$12 sps:$4 sm:$0xff]   ;;  %v5936_v24 = vld [vmem:[#allocation10 + $0x378] ss:$12 sps:$4 sm:$0xff]  }
  0xcb   :  { %1626 = vmatpush2.bf16.msra.mxu0 %v5846_v25  ;;  %v5941_v25 = vld [vmem:[#allocation10 + $0x364] ss:$12 sps:$4 sm:$0xff]  }
  0xcc   :  { %1696 = vmatpush1.bf16.msra.mxu1 %v5849_v26  ;;  %1627 = vmatprep.subr.bf16.mxu0 %v5854_v27  ;;  %v5957_v26 = vld [vmem:[#allocation10 + $0x528] ss:$12 sps:$4 sm:$0xff]   ;;  %v5959_v27 = vld [vmem:[#allocation10 + $0x52c] ss:$12 sps:$4 sm:$0xff]  }
  0xcd   :  { %1697 = vmatprep.subr.bf16.mxu1 %v5857_v28  ;;  %v5939_v28 = vld [vmem:[#allocation10 + $0x360] ss:$12 sps:$4 sm:$0xff]  }
  0xcf   :  { %1628 = vmatpush2.bf16.msra.mxu0 %v5852_v29  ;;  %v5965_v29 = vld [vmem:[#allocation10 + $0x514] ss:$12 sps:$4 sm:$0xff]  }
  0xd0   :  { %1698 = vmatpush1.bf16.msra.mxu1 %v5855_v30  ;;  %1629 = vmatprep.subr.bf16.mxu0 %v5860_v31  ;;  %v5944_v30 = vld [vmem:[#allocation10 + $0x34c] ss:$12 sps:$4 sm:$0xff]   ;;  %v5963_v31 = vld [vmem:[#allocation10 + $0x510] ss:$12 sps:$4 sm:$0xff]  }
  0xd1   :  { %1699 = vmatprep.subr.bf16.mxu1 %v5863_v32  ;;  %v5971_v32 = vld [vmem:[#allocation10 + $0x4fc] ss:$12 sps:$4 sm:$0xff]  }
  0xd3   :  { %1630 = vmatpush2.bf16.msra.mxu0 %v5858_v33  ;;  %v5942_v33 = vld [vmem:[#allocation10 + $0x348] ss:$12 sps:$4 sm:$0xff]  }
  0xd4   :  { %1700 = vmatpush1.bf16.msra.mxu1 %v5861_v34  ;;  %1631 = vmatprep.subr.bf16.mxu0 %v5866_v35  ;;  %v5947_v34 = vld [vmem:[#allocation10 + $0x334] ss:$12 sps:$4 sm:$0xff]   ;;  %v5969_v35 = vld [vmem:[#allocation10 + $0x4f8] ss:$12 sps:$4 sm:$0xff]  }
  0xd5   :  { %1701 = vmatprep.subr.bf16.mxu1 %v5869_v36  ;;  %v5977_v36 = vld [vmem:[#allocation10 + $0x4e4] ss:$12 sps:$4 sm:$0xff]  }
  0xd7   :  { %1632 = vmatpush2.bf16.msra.mxu0 %v5864_v38  ;;  %v5945_v38 = vld [vmem:[#allocation10 + $0x330] ss:$12 sps:$4 sm:$0xff]  }
  0xd8   :  { %1702 = vmatpush1.bf16.msra.mxu1 %v5867_v39  ;;  %1633 = vmatprep.subr.bf16.mxu0 %v5872_v40  ;;  %v5950_v39 = vld [vmem:[#allocation10 + $0x31c] ss:$12 sps:$4 sm:$0xff]   ;;  %v5975_v40 = vld [vmem:[#allocation10 + $0x4e0] ss:$12 sps:$4 sm:$0xff]  }
  0xd9   :  { %1703 = vmatprep.subr.bf16.mxu1 %v5875_v41  ;;  %v5983_v41 = vld [vmem:[#allocation10 + $0x4cc] ss:$12 sps:$4 sm:$0xff]  }
  0xdb   :  { %1634 = vmatpush2.bf16.msra.mxu0 %v5870_v42  ;;  %v5948_v42 = vld [vmem:[#allocation10 + $0x318] ss:$12 sps:$4 sm:$0xff]  }
  0xdc   :  { %1704 = vmatpush1.bf16.msra.mxu1 %v5873_v43  ;;  %1635 = vmatprep.subr.bf16.mxu0 %v5878_v44  ;;  %v5953_v43 = vld [vmem:[#allocation10 + $0x304] ss:$12 sps:$4 sm:$0xff]   ;;  %v5981_v44 = vld [vmem:[#allocation10 + $0x4c8] ss:$12 sps:$4 sm:$0xff]  }
  0xdd   :  { %1705 = vmatprep.subr.bf16.mxu1 %v5881_v45  ;;  %v5951_v45 = vld [vmem:[#allocation10 + $0x300] ss:$12 sps:$4 sm:$0xff]  }
  0xdf   :  { %1636 = vmatpush2.bf16.msra.mxu0 %v5876_v46  ;;  %v5956_v46 = vld [vmem:[#allocation10 + $0x46c] ss:$12 sps:$4 sm:$0xff]  }
  0xe0   :  { %1706 = vmatpush1.bf16.msra.mxu1 %v5879_v47  ;;  %1734 = vmatprep.subr.bf16.mxu0 %v5887_v49  ;;  %v5954_v47 = vld [vmem:[#allocation10 + $0x468] ss:$12 sps:$4 sm:$0xff]   ;;  %v5960_v49 = vld [vmem:[#allocation10 + $0x450] ss:$12 sps:$4 sm:$0xff]  }
  0xe1   :  { %1707 = vmatprep.subr.bf16.mxu1 %v5884_v48  ;;  %v5962_v48 = vld [vmem:[#allocation10 + $0x454] ss:$12 sps:$4 sm:$0xff]  }
  0xe2   :  { %1638 = vmatmul.mubr.bf16.vlgmr.msra.gmra.mxu0 %v6660_v12 }
  0xe3   :  { %1735 = vmatpush1.bf16.msra.mxu0 %v5885_v51  ;;  %1766 = vmatprep.mubr.bf16.mxu0 %v6597_v0  ;;  %v5968_v51 = vld [vmem:[#allocation10 + $0x43c] ss:$12 sps:$4 sm:$0xff]  }
  0xe4   :  { %1708 = vmatpush2.bf16.msra.mxu1 %v5882_v50  ;;  %1736 = vmatprep.subr.bf16.mxu0 %v5893_v53  ;;  %v5989_v50 = vld [vmem:[#allocation10 + $0x4b4] ss:$12 sps:$4 sm:$0xff]   ;;  %v5966_v53 = vld [vmem:[#allocation10 + $0x438] ss:$12 sps:$4 sm:$0xff]  }
  0xe5   :  { %1709 = vmatprep.subr.bf16.mxu1 %v5890_v52  ;;  %v5987_v52 = vld [vmem:[#allocation10 + $0x4b0] ss:$12 sps:$4 sm:$0xff]  }
  0xe7   :  { %1737 = vmatpush1.bf16.msra.mxu0 %v5891_v56  ;;  %v5974_v56 = vld [vmem:[#allocation10 + $0x424] ss:$12 sps:$4 sm:$0xff]  }
  0xe8   :  { %1710 = vmatpush2.bf16.msra.mxu1 %v5888_v55  ;;  %1738 = vmatprep.subr.bf16.mxu0 %v5899_v58  ;;  %v5995_v55 = vld [vmem:[#allocation10 + $0x49c] ss:$12 sps:$4 sm:$0xff]   ;;  %v5972_v58 = vld [vmem:[#allocation10 + $0x420] ss:$12 sps:$4 sm:$0xff]  }
  0xe9   :  { %1711 = vmatprep.subr.bf16.mxu1 %v5896_v57  ;;  %v5993_v57 = vld [vmem:[#allocation10 + $0x498] ss:$12 sps:$4 sm:$0xff]  }
  0xeb   :  { %1739 = vmatpush1.bf16.msra.mxu0 %v5897_v60  ;;  %v5980_v60 = vld [vmem:[#allocation10 + $0x40c] ss:$12 sps:$4 sm:$0xff]  }
  0xec   :  { %1712 = vmatpush2.bf16.msra.mxu1 %v5894_v59  ;;  %1740 = vmatprep.subr.bf16.mxu0 %v5905_v62  ;;  %v6001_v59 = vld [vmem:[#allocation10 + $0x484] ss:$12 sps:$4 sm:$0xff]   ;;  %v5978_v62 = vld [vmem:[#allocation10 + $0x408] ss:$12 sps:$4 sm:$0xff]  }
  0xed   :  { %1713 = vmatprep.subr.bf16.mxu1 %v5902_v61  ;;  %v5999_v61 = vld [vmem:[#allocation10 + $0x480] ss:$12 sps:$4 sm:$0xff]  }
  0xef   :  { %1741 = vmatpush1.bf16.msra.mxu0 %v5903_v1  ;;  %v5986_v1 = vld [vmem:[#allocation10 + $0x3f4] ss:$12 sps:$4 sm:$0xff]  }
  0xf0   :  { %1714 = vmatpush2.bf16.msra.mxu1 %v5900_v63  ;;  %1742 = vmatprep.subr.bf16.mxu0 %v5911_v3  ;;  %v6004_v63 = vld [vmem:[#allocation10 + $0x5ec] ss:$12 sps:$4 sm:$0xff]   ;;  %v195_v3 = vlaneseq }
  0xf1   :  { %1715 = vmatprep.subr.bf16.mxu1 %v5908_v2  ;;  %v6002_v2 = vld [vmem:[#allocation10 + $0x5e8] ss:$12 sps:$4 sm:$0xff]  }
  0xf3   :  { %1743 = vmatpush1.bf16.msra.mxu0 %v5909_v5  ;;  %v6007_v5 = vld [vmem:[#allocation10 + $0x5d0] ss:$12 sps:$4 sm:$0xff]  }
  0xf4   :  { %1716 = vmatpush2.bf16.msra.mxu1 %v5906_v4  ;;  %1744 = vmatprep.subr.bf16.mxu0 %v5917_v7  ;;  %v5984_v4 = vld [vmem:[#allocation10 + $0x3f0] ss:$12 sps:$4 sm:$0xff]  }
  0xf5   :  { %1717 = vmatprep.subr.bf16.mxu1 %v5914_v6  ;;  %v6009_v6 = vld [vmem:[#allocation10 + $0x5d4] ss:$12 sps:$4 sm:$0xff]   ;;  %v5992_v7 = vld [vmem:[#allocation10 + $0x3dc] ss:$12 sps:$4 sm:$0xff]  }
  0xf7   :  { %1745 = vmatpush1.bf16.msra.mxu0 %v5915_v9  ;;  %v5990_v9 = vld [vmem:[#allocation10 + $0x3d8] ss:$12 sps:$4 sm:$0xff]  }
  0xf8   :  { %1718 = vmatpush2.bf16.msra.mxu1 %v5912_v8  ;;  %1746 = vmatprep.subr.bf16.mxu0 %v5923_v11  ;;  %v6674_v8 = vshrl.u32 %v195_v3, 7  ;;  %v6014_v11 = vld [vmem:[#allocation10 + $0x5bc] ss:$12 sps:$4 sm:$0xff]  }
  0xf9   :  { %1719 = vmatprep.subr.bf16.mxu1 %v5920_v10  ;;  %v6012_v10 = vld [vmem:[#allocation10 + $0x5b8] ss:$12 sps:$4 sm:$0xff]  }
  0xfb   :  { %1747 = vmatpush1.bf16.msra.mxu0 %v5921_v14  ;;  %v6676_v14 = vld [vmem:[#allocation9] sm:$0xf] }
  0xfc   :  { %1720 = vmatpush2.bf16.msra.mxu1 %v5918_v13  ;;  %1748 = vmatprep.subr.bf16.mxu0 %v5929_v16  ;;  %v5998_v13 = vld [vmem:[#allocation10 + $0x3c4] ss:$12 sps:$4 sm:$0xff]   ;;  %v5996_v16 = vld [vmem:[#allocation10 + $0x3c0] ss:$12 sps:$4 sm:$0xff]  }
  0xfd   :  { %1721 = vmatprep.subr.bf16.mxu1 %v5926_v15  ;;  %v6679_v15 = vsub.s32 0, %v6674_v8 }
  0xff   :  { %1749 = vmatpush1.bf16.msra.mxu0 %v5927_v18  ;;  %v6019_v18 = vld [vmem:[#allocation10 + $0x5a4] ss:$12 sps:$4 sm:$0xff]  }
 0x100   :  { %1722 = vmatpush2.bf16.msra.mxu1 %v5924_v17  ;;  %2429 = vmatprep.subr.bf16.mxu0 %v5932_v19  ;;  %v6017_v17 = vld [vmem:[#allocation10 + $0x5a0] ss:$12 sps:$4 sm:$0xff]   ;;  %v6005_v19 = vld [vmem:[#allocation10 + $0x470] ss:$12 sps:$4 sm:$0xff]  }
 0x101   :  { %2472 = vmatprep.subr.bf16.mxu1 %v5959_v27 }
 0x102   :  { %1767 = vmatmul.mubr.bf16.vlgmr.msra.gmra.mxu0 %v6653_v37 }
 0x103   :  { %1724 = vmatmul.mubr.bf16.vlgmr.msra.gmra.mxu1 %v6660_v12  ;;  %2430 = vmatpush1.bf16.msra.mxu0 %v5930_v20  ;;  %v198_v20 = vrot.slane %v6676_v14, %v6679_v15 }
 0x104   :  { %2431 = vmatprep.subr.bf16.mxu0 %v5935_v21  ;;  %2473 = vmatpush1.bf16.msra.mxu1 %v5957_v26  ;;  %v6022_v21 = vld [vmem:[#allocation10 + $0x588] ss:$12 sps:$4 sm:$0xff]  }
 0x105   :  { %2474 = vmatprep.subr.bf16.mxu1 %v5965_v29 }
 0x107   :  { %2432 = vmatpush1.bf16.msra.mxu0 %v5933_v22  ;;  %v6024_v22 = vld [vmem:[#allocation10 + $0x58c] ss:$12 sps:$4 sm:$0xff]  }
 0x108   :  { %2433 = vmatprep.subr.bf16.mxu0 %v5938_v23  ;;  %2475 = vmatpush1.bf16.msra.mxu1 %v5963_v31 }
 0x109   :  { %2476 = vmatprep.subr.bf16.mxu1 %v5971_v32 }
 0x10b   :  { %2434 = vmatpush1.bf16.msra.mxu0 %v5936_v24 }
 0x10c   :  { %2435 = vmatprep.subr.bf16.mxu0 %v5941_v25  ;;  %2477 = vmatpush1.bf16.msra.mxu1 %v5969_v35 }
 0x10d   :  { %2478 = vmatprep.subr.bf16.mxu1 %v5977_v36  ;;  %v6032_v36 = vld [vmem:[#allocation10 + $0x558] ss:$12 sps:$4 sm:$0xff]  }
 0x10f   :  { %2436 = vmatpush1.bf16.msra.mxu0 %v5939_v28  ;;  %v6029_v28 = vld [vmem:[#allocation10 + $0x574] ss:$12 sps:$4 sm:$0xff]  }
 0x110   :  { %2437 = vmatprep.subr.bf16.mxu0 %v5944_v30  ;;  %2479 = vmatpush1.bf16.msra.mxu1 %v5975_v40  ;;  %v6027_v30 = vld [vmem:[#allocation10 + $0x570] ss:$12 sps:$4 sm:$0xff]  }
 0x111   :  { %2480 = vmatprep.subr.bf16.mxu1 %v5983_v41  ;;  %v6039_v40 = vld [vmem:[#allocation10 + $0x544] ss:$12 sps:$4 sm:$0xff]  }
 0x113   :  { %2438 = vmatpush1.bf16.msra.mxu0 %v5942_v33 }
 0x114   :  { %2439 = vmatprep.subr.bf16.mxu0 %v5947_v34  ;;  %2481 = vmatpush1.bf16.msra.mxu1 %v5981_v44  ;;  %v6034_v34 = vld [vmem:[#allocation10 + $0x55c] ss:$12 sps:$4 sm:$0xff]   ;;  %v6690_v44 = vsub.s32 2, %v6674_v8 }
 0x115   :  { %2482 = vmatprep.subr.bf16.mxu1 %v5989_v50 }
 0x117   :  { %2440 = vmatpush1.bf16.msra.mxu0 %v5945_v38 }
 0x118   :  { %2441 = vmatprep.subr.bf16.mxu0 %v5950_v39  ;;  %2483 = vmatpush1.bf16.msra.mxu1 %v5987_v52 }
 0x119   :  { %2484 = vmatprep.subr.bf16.mxu1 %v5995_v55 }
 0x11b   :  { %2442 = vmatpush1.bf16.msra.mxu0 %v5948_v42  ;;  %v6037_v42 = vld [vmem:[#allocation10 + $0x540] ss:$12 sps:$4 sm:$0xff]  }
 0x11c   :  { %2443 = vmatprep.subr.bf16.mxu0 %v5953_v43  ;;  %2485 = vmatpush1.bf16.msra.mxu1 %v5993_v57  ;;  %v6042_v43 = vld [vmem:[#allocation10 + $0x5f0] ss:$12 sps:$4 sm:$0xff]  }
 0x11d   :  { %2486 = vmatprep.subr.bf16.mxu1 %v6001_v59 }
 0x11f   :  { %2444 = vmatpush1.bf16.msra.mxu0 %v5951_v45  ;;  %v6693_v45 = vsub.s32 3, %v6674_v8 }
 0x120   :  { %2445 = vmatprep.subr.bf16.mxu0 %v5956_v46  ;;  %2487 = vmatpush1.bf16.msra.mxu1 %v5999_v61  ;;  %v206_v46 = vrot.slane %v6676_v14, %v6690_v44 }
 0x121   :  { %2488 = vmatprep.subr.bf16.mxu1 %v6004_v63 }
 0x123   :  { %2446 = vmatpush2.bf16.msra.mxu0 %v5954_v47  ;;  %v772_v23 = vpop.f32.mrf.mxu1 }
 0x124   :  { %2447 = vmatprep.subr.bf16.mxu0 %v5962_v48  ;;  %2489 = vmatpush2.bf16.msra.mxu1 %v6002_v2 }
 0x125   :  { %2490 = vmatprep.subr.bf16.mxu1 %v6009_v6  ;;  %v6683_v26 = vpop.f32.mrf.mxu1 }
 0x127   :  { %2448 = vmatpush2.bf16.msra.mxu0 %v5960_v49  ;;  %v776_v33 = vpop.f32.mrf.mxu1  ;;  %v210_v49 = vrot.slane %v6676_v14, %v6693_v45 }
 0x128   :  { %2449 = vmatprep.subr.bf16.mxu0 %v5968_v51  ;;  %2491 = vmatpush2.bf16.msra.mxu1 %v6007_v5 }
 0x129   :  { %2492 = vmatprep.subr.bf16.mxu1 %v6014_v11  ;;  %v6697_v47 = vpop.f32.mrf.mxu1 }
 0x12b   :  { %2450 = vmatpush2.bf16.msra.mxu0 %v5966_v53 }
 0x12c   :  { %2451 = vmatprep.subr.bf16.mxu0 %v5974_v56  ;;  %2493 = vmatpush2.bf16.msra.mxu1 %v6012_v10 }
 0x12d   :  { %2494 = vmatprep.subr.bf16.mxu1 %v6019_v18 }
 0x12f   :  { %2452 = vmatpush2.bf16.msra.mxu0 %v5972_v58 }
 0x130   :  { %2453 = vmatprep.subr.bf16.mxu0 %v5980_v60  ;;  %2495 = vmatpush2.bf16.msra.mxu1 %v6017_v17 }
 0x131   :  { %2496 = vmatprep.subr.bf16.mxu1 %v6024_v22 }
 0x133   :  { %2454 = vmatpush2.bf16.msra.mxu0 %v5978_v62 }
 0x134   :  { %2455 = vmatprep.subr.bf16.mxu0 %v5986_v1  ;;  %2497 = vmatpush2.bf16.msra.mxu1 %v6022_v21 }
 0x135   :  { %2498 = vmatprep.subr.bf16.mxu1 %v6029_v28 }
 0x137   :  { %2456 = vmatpush2.bf16.msra.mxu0 %v5984_v4 }
 0x138   :  { %2457 = vmatprep.subr.bf16.mxu0 %v5992_v7  ;;  %2499 = vmatpush2.bf16.msra.mxu1 %v6027_v30 }
 0x139   :  { %2500 = vmatprep.subr.bf16.mxu1 %v6034_v34 }
 0x13b   :  { %2458 = vmatpush2.bf16.msra.mxu0 %v5990_v9 }
 0x13c   :  { %2459 = vmatprep.subr.bf16.mxu0 %v5998_v13  ;;  %2501 = vmatpush2.bf16.msra.mxu1 %v6032_v36  ;;  %v6708_v13 = vsub.s32 1, %v6674_v8 }
 0x13d   :  { %2502 = vmatprep.subr.bf16.mxu1 %v6039_v40 }
 0x13f   :  { %2460 = vmatpush2.bf16.msra.mxu0 %v5996_v16  ;;  %v1103_v16 = vld [vmem:[#allocation9 + $0x4] sm:$0xf] }
 0x140   :  { %5497 = vmatprep.subr.bf16.mxu0 %v6005_v19  ;;  %2503 = vmatpush2.bf16.msra.mxu1 %v6037_v42  ;;  %v1112_v17 = vrot.slane %v1103_v16, %v6708_v13  ;;  %v1108_v19 = vrot.slane %v1103_v16, %v6679_v15  ;;  %v6006_v42 = vld [vmem:[#allocation10 + $0x3b0] ss:$12 sps:$4 sm:$0xff]  }
 0x141   :  { %5519 = vmatprep.subr.bf16.mxu1 %v6042_v43 }
 0x142   :  { %v729_v24 = vpop.f32.mrf.mxu0 }
 0x143   :  { %v730_v25 = vadd.f32 %v729_v24, %v198_v20 }
 0x144   :  { %v6685_v27 = vpop.f32.mrf.mxu0 }
 0x145   :  { %v773_v29 = vadd.f32 %v772_v23, %v730_v25 }
 0x146   :  { %v733_v31 = vpop.f32.mrf.mxu0 }
 0x147   :  { %v734_v32 = vadd.f32 %v733_v31, %v198_v20  ;;  %v867_v38 = vmax.f32 %v773_v29, 0.0 }
 0x148   :  { %v6699_v48 = vpop.f32.mrf.mxu0 }
 0x149   :  { %v777_v35 = vadd.f32 %v776_v33, %v734_v32 }
 0x14b   :  { %v871_v39 = vmax.f32 %v777_v35, 0.0 }
 0x14d   :  { %v6687_v41 = vpack.c.bf16 %v871_v39, %v867_v38 }
 0x162   :  { %v858_v51 = vpop.f32.mrf.mxu0 }
 0x163   :  { %v815_v50 = vpop.f32.mrf.mxu1 }
 0x164   :  { %v816_v52 = vadd.f32 %v815_v50, %v206_v46  ;;  %v860_v55 = vpop.f32.mrf.mxu0  ;;  %v6015_v50 = vld [vmem:[#allocation10 + $0x440] ss:$12 sps:$4 sm:$0xff]  }
 0x165   :  { %v817_v53 = vpop.f32.mrf.mxu1 }
 0x166   :  { %v859_v56 = vadd.f32 %v858_v51, %v816_v52  ;;  %v818_v57 = vadd.f32 %v817_v53, %v210_v49  ;;  %v862_v59 = vpop.f32.mrf.mxu0  ;;  %v6016_v51 = vld [vmem:[#allocation10 + $0x380] ss:$12 sps:$4 sm:$0xff]   ;;  %v6020_v52 = vld [vmem:[#allocation10 + $0x428] ss:$12 sps:$4 sm:$0xff]  }
 0x167   :  { %v819_v58 = vpop.f32.mrf.mxu1  ;;  %v6021_v53 = vld [vmem:[#allocation10 + $0x368] ss:$12 sps:$4 sm:$0xff]  }
 0x168   :  { %v861_v60 = vadd.f32 %v860_v55, %v818_v57  ;;  %v820_v61 = vadd.f32 %v819_v58, %v206_v46  ;;  %v864_v2 = vpop.f32.mrf.mxu0  ;;  %v869_v3 = vmax.f32 %v859_v56, 0.0  ;;  %v6010_v46 = vld [vmem:[#allocation10 + $0x458] ss:$12 sps:$4 sm:$0xff]   ;;  %v6025_v55 = vld [vmem:[#allocation10 + $0x410] ss:$12 sps:$4 sm:$0xff]   ;;  %v1120_v58 = vrot.slane %v1103_v16, %v6693_v45 }
 0x169   :  { %v821_v62 = vpop.f32.mrf.mxu1  ;;  %v6026_v56 = vld [vmem:[#allocation10 + $0x350] ss:$12 sps:$4 sm:$0xff]   ;;  %v6030_v57 = vld [vmem:[#allocation10 + $0x3f8] ss:$12 sps:$4 sm:$0xff]  }
 0x16a   :  { %v863_v63 = vadd.f32 %v862_v59, %v820_v61  ;;  %v822_v1 = vadd.f32 %v821_v62, %v210_v49  ;;  %v870_v6 = vmax.f32 %v861_v60, 0.0  ;;  %v6011_v49 = vld [vmem:[#allocation10 + $0x398] ss:$12 sps:$4 sm:$0xff]   ;;  %v1116_v59 = vrot.slane %v1103_v16, %v6690_v44  ;;  %v6036_v16 = vld [vmem:[#allocation10 + $0x320] ss:$12 sps:$4 sm:$0xff]  }
 0x16b   :  { %v6031_v62 = vld [vmem:[#allocation10 + $0x338] ss:$12 sps:$4 sm:$0xff]  }
 0x16c   :  { %v873_v4 = vmax.f32 %v863_v63, 0.0  ;;  %v865_v5 = vadd.f32 %v864_v2, %v822_v1  ;;  %v202_v63 = vrot.slane %v6676_v14, %v6708_v13 }
 0x16e   :  { %v6703_v7 = vpack.c.bf16 %v873_v4, %v869_v3  ;;  %v874_v9 = vmax.f32 %v865_v5, 0.0  ;;  %v6035_v3 = vld [vmem:[#allocation10 + $0x3e0] ss:$12 sps:$4 sm:$0xff]   ;;  %v736_v5 = vadd.f32 %v6699_v48, %v202_v63  ;;  %v6041_v48 = vld [vmem:[#allocation10 + $0x308] ss:$12 sps:$4 sm:$0xff]  }
 0x170   :  { %v6705_v10 = vpack.c.bf16 %v874_v9, %v870_v6 }
 0x183   :  { %v1682_v11 = vpop.f32.mrf.mxu1 }
 0x185   :  { %v1684_v18 = vpop.f32.mrf.mxu1 }
 0x187   :  { %v1686_v23 = vpop.f32.mrf.mxu1 }
 0x189   :  { %v1688_v33 = vpop.f32.mrf.mxu1 }
 0x1a2   :  { %v1639_v20 = vpop.f32.mrf.mxu0 }
 0x1a3   :  { %v1640_v24 = vadd.f32 %v1639_v20, %v1108_v19  ;;  %v6040_v20 = vld [vmem:[#allocation10 + $0x3c8] ss:$12 sps:$4 sm:$0xff]  }
 0x1a4   :  { %v1641_v21 = vpop.f32.mrf.mxu0 }
 0x1a5   :  { %v1642_v22 = vadd.f32 %v1641_v21, %v1112_v17  ;;  %v1683_v8 = vadd.f32 %v1682_v11, %v1640_v24 }
 0x1a6   :  { %v1643_v25 = vpop.f32.mrf.mxu0 }
 0x1a7   :  { %v1644_v28 = vadd.f32 %v1643_v25, %v1108_v19  ;;  %v1685_v30 = vadd.f32 %v1684_v18, %v1642_v22  ;;  %v1777_v39 = vmax.f32 %v1683_v8, 0.0  ;;  %v732_v18 = vadd.f32 %v6685_v27, %v202_v63  ;;  %v6068_v63 = vld [vmem:[#allocation10 + $0x30] ss:$12 sps:$4 sm:$0xff]  }
 0x1a8   :  { %v1645_v29 = vpop.f32.mrf.mxu0 }
 0x1a9   :  { %v1687_v31 = vadd.f32 %v1686_v23, %v1644_v28  ;;  %v1646_v32 = vadd.f32 %v1645_v29, %v1112_v17  ;;  %v1778_v36 = vmax.f32 %v1685_v30, 0.0  ;;  %v779_v23 = vadd.f32 %v6697_v47, %v736_v5  ;;  %v6076_v5 = vld [vmem:[#allocation10 + $0x4a0] ss:$12 sps:$4 sm:$0xff]  }
 0x1aa   :  { %v775_v29 = vadd.f32 %v6683_v26, %v732_v18  ;;  %v6087_v18 = vld [vmem:[#allocation10 + $0x22c] ss:$12 sps:$4 sm:$0xff]  }
 0x1ab   :  { %v1689_v34 = vadd.f32 %v1688_v33, %v1646_v32  ;;  %v1781_v35 = vmax.f32 %v1687_v31, 0.0  ;;  %v6045_v31 = vld [vmem:[#allocation10 + $0xac] ss:$12 sps:$4 sm:$0xff]   ;;  %v872_v33 = vmax.f32 %v779_v23, 0.0  ;;  %v6091_v23 = vld [vmem:[#allocation10 + $0x210] ss:$12 sps:$4 sm:$0xff]  }
 0x1ad   :  { %v1782_v38 = vmax.f32 %v1689_v34, 0.0  ;;  %v6712_v43 = vpack.c.bf16 %v1781_v35, %v1777_v39  ;;  %v6043_v35 = vld [vmem:[#allocation10 + $0xa8] ss:$12 sps:$4 sm:$0xff]   ;;  %v6047_v39 = vld [vmem:[#allocation10 + $0x5d8] ss:$12 sps:$4 sm:$0xff]  }
 0x1af   :  { %v1786_v40 = vpack.c.bf16 %v1782_v38, %v1778_v36  ;;  %v6046_v36 = vld [vmem:[#allocation10 + $0x530] ss:$12 sps:$4 sm:$0xff]   ;;  %v868_v38 = vmax.f32 %v775_v29, 0.0 }
 0x1b0   :  { %v6102_v29 = vld [vmem:[#allocation10 + $0x124] ss:$12 sps:$4 sm:$0xff]  }
 0x1b1   :  { %2461 = vmatprep.mubr.bf16.mxu0 %v1786_v40  ;;  %v6727_v26 = vpack.c.bf16 %v872_v33, %v868_v38  ;;  %v6111_v33 = vld [vmem:[#allocation10 + $0x1cc] ss:$12 sps:$4 sm:$0xff]   ;;  %v6112_v38 = vld [vmem:[#allocation10 + $0xf0] ss:$12 sps:$4 sm:$0xff]  }
 0x1b2   :  { %2462 = vmatmul.mubr.bf16.vlgmr.msra.gmra.mxu0 %v6712_v43 }
 0x1b3   :  { %5498 = vmatpush3.bf16.msra.mxu0 %v6006_v42  ;;  %2547 = vmatprep.mubr.bf16.mxu0 %v1786_v40  ;;  %v6050_v40 = vld [vmem:[#allocation10 + $0x94] ss:$12 sps:$4 sm:$0xff]   ;;  %v6048_v42 = vld [vmem:[#allocation10 + $0x90] ss:$12 sps:$4 sm:$0xff]  }
 0x1b4   :  { %5499 = vmatprep.subr.bf16.mxu0 %v6010_v46  ;;  %v6051_v46 = vld [vmem:[#allocation10 + $0x518] ss:$12 sps:$4 sm:$0xff]  }
 0x1b7   :  { %5500 = vmatpush3.bf16.msra.mxu0 %v6011_v49  ;;  %v6052_v49 = vld [vmem:[#allocation10 + $0x5c0] ss:$12 sps:$4 sm:$0xff]  }
 0x1b8   :  { %5501 = vmatprep.subr.bf16.mxu0 %v6015_v50  ;;  %v6055_v50 = vld [vmem:[#allocation10 + $0x7c] ss:$12 sps:$4 sm:$0xff]  }
 0x1bb   :  { %5502 = vmatpush3.bf16.msra.mxu0 %v6016_v51  ;;  %v6053_v51 = vld [vmem:[#allocation10 + $0x78] ss:$12 sps:$4 sm:$0xff]  }
 0x1bc   :  { %5503 = vmatprep.subr.bf16.mxu0 %v6020_v52  ;;  %v6056_v52 = vld [vmem:[#allocation10 + $0x500] ss:$12 sps:$4 sm:$0xff]  }
 0x1bf   :  { %5504 = vmatpush3.bf16.msra.mxu0 %v6021_v53  ;;  %v6060_v53 = vld [vmem:[#allocation10 + $0x64] ss:$12 sps:$4 sm:$0xff]  }
 0x1c0   :  { %5505 = vmatprep.subr.bf16.mxu0 %v6025_v55  ;;  %v6058_v55 = vld [vmem:[#allocation10 + $0x60] ss:$12 sps:$4 sm:$0xff]  }
 0x1c2   :  { %v1768_v61 = vpop.f32.mrf.mxu0 }
 0x1c3   :  { %v1725_v60 = vpop.f32.mrf.mxu1  ;;  %5506 = vmatpush3.bf16.msra.mxu0 %v6026_v56  ;;  %v6061_v56 = vld [vmem:[#allocation10 + $0x4e8] ss:$12 sps:$4 sm:$0xff]  }
 0x1c4   :  { %v1770_v2 = vpop.f32.mrf.mxu0  ;;  %5507 = vmatprep.subr.bf16.mxu0 %v6030_v57  ;;  %v1726_v6 = vadd.f32 %v1725_v60, %v1116_v59  ;;  %v6062_v57 = vld [vmem:[#allocation10 + $0x590] ss:$12 sps:$4 sm:$0xff]  }
 0x1c5   :  { %v1727_v1 = vpop.f32.mrf.mxu1  ;;  %v6066_v60 = vld [vmem:[#allocation10 + $0x4d0] ss:$12 sps:$4 sm:$0xff]  }
 0x1c6   :  { %v1728_v4 = vadd.f32 %v1727_v1, %v1120_v58  ;;  %v1772_v11 = vpop.f32.mrf.mxu0  ;;  %v1769_v24 = vadd.f32 %v1768_v61, %v1726_v6  ;;  %v6067_v61 = vld [vmem:[#allocation10 + $0x578] ss:$12 sps:$4 sm:$0xff]   ;;  %v6077_v6 = vld [vmem:[#allocation10 + $0x548] ss:$12 sps:$4 sm:$0xff]  }
 0x1c7   :  { %v1729_v9 = vpop.f32.mrf.mxu1  ;;  %5508 = vmatpush3.bf16.msra.mxu0 %v6031_v62  ;;  %v6070_v62 = vld [vmem:[#allocation10 + $0x34] ss:$12 sps:$4 sm:$0xff]   ;;  %v6071_v1 = vld [vmem:[#allocation10 + $0x4b8] ss:$12 sps:$4 sm:$0xff]  }
 0x1c8   :  { %v1730_v17 = vadd.f32 %v1729_v9, %v1116_v59  ;;  %5509 = vmatprep.subr.bf16.mxu0 %v6035_v3  ;;  %v1771_v21 = vadd.f32 %v1770_v2, %v1728_v4  ;;  %v1774_v25 = vpop.f32.mrf.mxu0  ;;  %v1779_v8 = vmax.f32 %v1769_v24, 0.0  ;;  %v6063_v59 = vld [vmem:[#allocation10 + $0x48] ss:$12 sps:$4 sm:$0xff]   ;;  %v6072_v2 = vld [vmem:[#allocation10 + $0x560] ss:$12 sps:$4 sm:$0xff]  }
 0x1c9   :  { %v1731_v19 = vpop.f32.mrf.mxu1  ;;  %v6075_v3 = vld [vmem:[#allocation10 + $0x1c] ss:$12 sps:$4 sm:$0xff]   ;;  %v6073_v4 = vld [vmem:[#allocation10 + $0x18] ss:$12 sps:$4 sm:$0xff]  }
 0x1ca   :  { %v1773_v14 = vadd.f32 %v1772_v11, %v1730_v17  ;;  %v1732_v22 = vadd.f32 %v1731_v19, %v1120_v58  ;;  %v1780_v32 = vmax.f32 %v1771_v21, 0.0  ;;  %v6065_v58 = vld [vmem:[#allocation10 + $0x4c] ss:$12 sps:$4 sm:$0xff]   ;;  %v6080_v9 = vld [vmem:[#allocation10 + $0x4] ss:$12 sps:$4 sm:$0xff]  }
 0x1cb   :  { %5510 = vmatpush3.bf16.msra.mxu0 %v6036_v16  ;;  %v6078_v11 = vld [vmem:[#allocation10] ss:$12 sps:$4 sm:$0xff]   ;;  %v6081_v17 = vld [vmem:[#allocation10 + $0x488] ss:$12 sps:$4 sm:$0xff]  }
 0x1cc   :  { %v1775_v28 = vadd.f32 %v1774_v25, %v1732_v22  ;;  %v1783_v30 = vmax.f32 %v1773_v14, 0.0  ;;  %5511 = vmatprep.subr.bf16.mxu0 %v6040_v20  ;;  %v6084_v16 = vld [vmem:[#allocation10 + $0x16c] ss:$12 sps:$4 sm:$0xff]   ;;  %v6082_v19 = vld [vmem:[#allocation10 + $0x168] ss:$12 sps:$4 sm:$0xff]  }
 0x1cd   :  { %v6085_v20 = vld [vmem:[#allocation10 + $0x228] ss:$12 sps:$4 sm:$0xff]   ;;  %v6088_v22 = vld [vmem:[#allocation10 + $0x150] ss:$12 sps:$4 sm:$0xff]  }
 0x1ce   :  { %v1784_v27 = vmax.f32 %v1775_v28, 0.0  ;;  %v6723_v47 = vpack.c.bf16 %v1783_v30, %v1779_v8  ;;  %v6090_v21 = vld [vmem:[#allocation10 + $0x154] ss:$12 sps:$4 sm:$0xff]   ;;  %v6096_v24 = vld [vmem:[#allocation10 + $0x13c] ss:$12 sps:$4 sm:$0xff]  }
 0x1cf   :  { %5512 = vmatpush3.bf16.msra.mxu0 %v6041_v48  ;;  %v6093_v14 = vld [vmem:[#allocation10 + $0x214] ss:$12 sps:$4 sm:$0xff]   ;;  %v6099_v25 = vld [vmem:[#allocation10 + $0x1fc] ss:$12 sps:$4 sm:$0xff]   ;;  %v6094_v28 = vld [vmem:[#allocation10 + $0x138] ss:$12 sps:$4 sm:$0xff]  }
 0x1d0   :  { %v1788_v34 = vpack.c.bf16 %v1784_v27, %v1780_v32  ;;  %3109 = vmatprep.subr.bf16.mxu0 %v6045_v31  ;;  %v6097_v48 = vld [vmem:[#allocation10 + $0x1f8] ss:$12 sps:$4 sm:$0xff]   ;;  %v6100_v31 = vld [vmem:[#allocation10 + $0x120] ss:$12 sps:$4 sm:$0xff]   ;;  %v6106_v8 = vld [vmem:[#allocation10 + $0x108] ss:$12 sps:$4 sm:$0xff]  }
 0x1d1   :  { %v6105_v30 = vld [vmem:[#allocation10 + $0x1e4] ss:$12 sps:$4 sm:$0xff]   ;;  %v6103_v32 = vld [vmem:[#allocation10 + $0x1e0] ss:$12 sps:$4 sm:$0xff]  }
 0x1d2   :  { %2504 = vmatprep.mubr.bf16.mxu1 %v1788_v34  ;;  %2548 = vmatmul.mubr.bf16.vlgmr.msra.gmra.mxu0 %v6712_v43  ;;  %v6057_v43 = vld [vmem:[#allocation10 + $0x5a8] ss:$12 sps:$4 sm:$0xff]   ;;  %v6108_v27 = vld [vmem:[#allocation10 + $0x10c] ss:$12 sps:$4 sm:$0xff]  }
 0x1d3   :  { %2505 = vmatmul.mubr.bf16.vlgmr.msra.gmra.mxu1 %v6723_v47  ;;  %3110 = vmatpush1.bf16.msra.mxu0 %v6043_v35  ;;  %v6114_v35 = vld [vmem:[#allocation10 + $0xf4] ss:$12 sps:$4 sm:$0xff]  }
 0x1d4   :  { %5520 = vmatpush3.bf16.msra.mxu1 %v6046_v36  ;;  %3141 = vmatprep.mubr.bf16.mxu0 %v6727_v26  ;;  %v6117_v36 = vld [vmem:[#allocation10 + $0x1b4] ss:$12 sps:$4 sm:$0xff]  }
 0x1d5   :  { %2588 = vmatprep.mubr.bf16.mxu1 %v1788_v34  ;;  %5521 = vmatprep.subr.bf16.mxu1 %v6047_v39  ;;  %v6109_v34 = vld [vmem:[#allocation10 + $0x1c8] ss:$12 sps:$4 sm:$0xff]  }
 0x1d6   :  { %3111 = vmatprep.subr.bf16.mxu0 %v6050_v40  ;;  %v6120_v39 = vld [vmem:[#allocation10 + $0xdc] ss:$12 sps:$4 sm:$0xff]  }
 0x1d7   :  { %3112 = vmatpush1.bf16.msra.mxu0 %v6048_v42  ;;  %v6123_v40 = vld [vmem:[#allocation10 + $0x19c] ss:$12 sps:$4 sm:$0xff]   ;;  %v6118_v42 = vld [vmem:[#allocation10 + $0xd8] ss:$12 sps:$4 sm:$0xff]  }
 0x1d8   :  { %5522 = vmatpush3.bf16.msra.mxu1 %v6051_v46  ;;  %3113 = vmatprep.subr.bf16.mxu0 %v6055_v50  ;;  %v6121_v46 = vld [vmem:[#allocation10 + $0x198] ss:$12 sps:$4 sm:$0xff]  }
 0x1d9   :  { %5523 = vmatprep.subr.bf16.mxu1 %v6052_v49  ;;  %v6126_v49 = vld [vmem:[#allocation10 + $0xc4] ss:$12 sps:$4 sm:$0xff]  }
 0x1da   :  { %v6129_v50 = vld [vmem:[#allocation10 + $0x184] ss:$12 sps:$4 sm:$0xff]  }
 0x1db   :  { %3114 = vmatpush1.bf16.msra.mxu0 %v6053_v51  ;;  %v6124_v51 = vld [vmem:[#allocation10 + $0xc0] ss:$12 sps:$4 sm:$0xff]  }
 0x1dc   :  { %5524 = vmatpush3.bf16.msra.mxu1 %v6056_v52  ;;  %3115 = vmatprep.subr.bf16.mxu0 %v6060_v53  ;;  %v6127_v52 = vld [vmem:[#allocation10 + $0x180] ss:$12 sps:$4 sm:$0xff]   ;;  %v6133_v53 = vld [vmem:[#allocation10 + $0x170] ss:$12 sps:$4 sm:$0xff]  }
 0x1dd   :  { %5525 = vmatprep.subr.bf16.mxu1 %v6057_v43  ;;  %v6132_v43 = vld [vmem:[#allocation10 + $0x2ec] ss:$12 sps:$4 sm:$0xff]  }
 0x1df   :  { %3116 = vmatpush1.bf16.msra.mxu0 %v6058_v55  ;;  %v6130_v55 = vld [vmem:[#allocation10 + $0x2e8] ss:$12 sps:$4 sm:$0xff]  }
 0x1e0   :  { %5526 = vmatpush3.bf16.msra.mxu1 %v6061_v56  ;;  %3117 = vmatprep.subr.bf16.mxu0 %v6065_v58  ;;  %v6134_v56 = vld [vmem:[#allocation10 + $0xb0] ss:$12 sps:$4 sm:$0xff]   ;;  %v6138_v58 = vld [vmem:[#allocation10 + $0x158] ss:$12 sps:$4 sm:$0xff]  }
 0x1e1   :  { %5527 = vmatprep.subr.bf16.mxu1 %v6062_v57  ;;  %v6137_v57 = vld [vmem:[#allocation10 + $0x2d4] ss:$12 sps:$4 sm:$0xff]  }
 0x1e3   :  { %3118 = vmatpush1.bf16.msra.mxu0 %v6063_v59  ;;  %v6135_v59 = vld [vmem:[#allocation10 + $0x2d0] ss:$12 sps:$4 sm:$0xff]  }
 0x1e4   :  { %5528 = vmatpush3.bf16.msra.mxu1 %v6066_v60  ;;  %3119 = vmatprep.subr.bf16.mxu0 %v6070_v62  ;;  %v6139_v60 = vld [vmem:[#allocation10 + $0x98] ss:$12 sps:$4 sm:$0xff]   ;;  %v6143_v62 = vld [vmem:[#allocation10 + $0x140] ss:$12 sps:$4 sm:$0xff]  }
 0x1e5   :  { %5529 = vmatprep.subr.bf16.mxu1 %v6067_v61  ;;  %v6142_v61 = vld [vmem:[#allocation10 + $0x2bc] ss:$12 sps:$4 sm:$0xff]  }
 0x1e7   :  { %3120 = vmatpush1.bf16.msra.mxu0 %v6068_v63  ;;  %v6140_v63 = vld [vmem:[#allocation10 + $0x2b8] ss:$12 sps:$4 sm:$0xff]  }
 0x1e8   :  { %5530 = vmatpush3.bf16.msra.mxu1 %v6071_v1  ;;  %3121 = vmatprep.subr.bf16.mxu0 %v6075_v3  ;;  %v6144_v1 = vld [vmem:[#allocation10 + $0x80] ss:$12 sps:$4 sm:$0xff]   ;;  %v6148_v3 = vld [vmem:[#allocation10 + $0x128] ss:$12 sps:$4 sm:$0xff]  }
 0x1e9   :  { %5531 = vmatprep.subr.bf16.mxu1 %v6072_v2  ;;  %v6147_v2 = vld [vmem:[#allocation10 + $0x2a4] ss:$12 sps:$4 sm:$0xff]  }
 0x1eb   :  { %3122 = vmatpush1.bf16.msra.mxu0 %v6073_v4  ;;  %v6145_v4 = vld [vmem:[#allocation10 + $0x2a0] ss:$12 sps:$4 sm:$0xff]  }
 0x1ec   :  { %5532 = vmatpush3.bf16.msra.mxu1 %v6076_v5  ;;  %3123 = vmatprep.subr.bf16.mxu0 %v6080_v9  ;;  %v6149_v5 = vld [vmem:[#allocation10 + $0x68] ss:$12 sps:$4 sm:$0xff]  }
 0x1ed   :  { %5533 = vmatprep.subr.bf16.mxu1 %v6077_v6  ;;  %v6152_v6 = vld [vmem:[#allocation10 + $0x28c] ss:$12 sps:$4 sm:$0xff]   ;;  %v6150_v9 = vld [vmem:[#allocation10 + $0x288] ss:$12 sps:$4 sm:$0xff]  }
 0x1ef   :  { %3124 = vmatpush1.bf16.msra.mxu0 %v6078_v11  ;;  %v6154_v11 = vld [vmem:[#allocation10 + $0x50] ss:$12 sps:$4 sm:$0xff]  }
 0x1f0   :  { %5534 = vmatpush3.bf16.msra.mxu1 %v6081_v17  ;;  %3125 = vmatprep.subr.bf16.mxu0 %v6084_v16  ;;  %v6157_v17 = vld [vmem:[#allocation10 + $0x274] ss:$12 sps:$4 sm:$0xff]   ;;  %v6158_v16 = vld [vmem:[#allocation10 + $0xf8] ss:$12 sps:$4 sm:$0xff]  }
 0x1f1   :  { %3152 = vmatprep.subr.bf16.mxu1 %v6087_v18  ;;  %v6155_v18 = vld [vmem:[#allocation10 + $0x270] ss:$12 sps:$4 sm:$0xff]  }
 0x1f3   :  { %2589 = vmatmul.mubr.bf16.vlgmr.msra.gmra.mxu1 %v6723_v47  ;;  %3126 = vmatpush2.bf16.msra.mxu0 %v6082_v19  ;;  %v6115_v47 = vld [vmem:[#allocation10 + $0x1b0] ss:$12 sps:$4 sm:$0xff]   ;;  %v6159_v19 = vld [vmem:[#allocation10 + $0x38] ss:$12 sps:$4 sm:$0xff]  }
 0x1f4   :  { %3153 = vmatpush1.bf16.msra.mxu1 %v6085_v20  ;;  %3184 = vmatprep.mubr.bf16.mxu1 %v6705_v10  ;;  %v6162_v20 = vld [vmem:[#allocation10 + $0x25c] ss:$12 sps:$4 sm:$0xff]  }
 0x1f5   :  { %3127 = vmatprep.subr.bf16.mxu0 %v6090_v21  ;;  %3154 = vmatprep.subr.bf16.mxu1 %v6093_v14  ;;  %v6163_v21 = vld [vmem:[#allocation10 + $0xe0] ss:$12 sps:$4 sm:$0xff]   ;;  %v6160_v14 = vld [vmem:[#allocation10 + $0x258] ss:$12 sps:$4 sm:$0xff]  }
 0x1f7   :  { %3128 = vmatpush2.bf16.msra.mxu0 %v6088_v22  ;;  %v6164_v22 = vld [vmem:[#allocation10 + $0x20] ss:$12 sps:$4 sm:$0xff]  }
 0x1f8   :  { %3155 = vmatpush1.bf16.msra.mxu1 %v6091_v23  ;;  %3129 = vmatprep.subr.bf16.mxu0 %v6096_v24  ;;  %v6167_v23 = vld [vmem:[#allocation10 + $0x244] ss:$12 sps:$4 sm:$0xff]   ;;  %v6168_v24 = vld [vmem:[#allocation10 + $0xc8] ss:$12 sps:$4 sm:$0xff]  }
 0x1f9   :  { %3156 = vmatprep.subr.bf16.mxu1 %v6099_v25  ;;  %v6165_v25 = vld [vmem:[#allocation10 + $0x240] ss:$12 sps:$4 sm:$0xff]  }
 0x1fb   :  { %3130 = vmatpush2.bf16.msra.mxu0 %v6094_v28  ;;  %v6169_v28 = vld [vmem:[#allocation10 + $0x8] ss:$12 sps:$4 sm:$0xff]  }
 0x1fc   :  { %3157 = vmatpush1.bf16.msra.mxu1 %v6097_v48  ;;  %3131 = vmatprep.subr.bf16.mxu0 %v6102_v29  ;;  %v6170_v48 = vld [vmem:[#allocation10 + $0x2f0] ss:$12 sps:$4 sm:$0xff]   ;;  %v6173_v29 = vld [vmem:[#allocation7 + $0x2c4] ss:$48 sps:$4 sm:$0xff]  }
 0x1fd   :  { %3158 = vmatprep.subr.bf16.mxu1 %v6105_v30  ;;  %v6174_v30 = vld [vmem:[#allocation10 + $0x230] ss:$12 sps:$4 sm:$0xff]  }
 0x1ff   :  { %3132 = vmatpush2.bf16.msra.mxu0 %v6100_v31  ;;  %v6171_v31 = vld [vmem:[#allocation7 + $0x2c0] ss:$48 sps:$4 sm:$0xff]  }
 0x200   :  { %3159 = vmatpush1.bf16.msra.mxu1 %v6103_v32  ;;  %3133 = vmatprep.subr.bf16.mxu0 %v6108_v27  ;;  %v6175_v32 = vld [vmem:[#allocation10 + $0x2d8] ss:$12 sps:$4 sm:$0xff]  }
 0x201   :  { %3160 = vmatprep.subr.bf16.mxu1 %v6111_v33  ;;  %v6178_v27 = vld [vmem:[#allocation7 + $0x264] ss:$48 sps:$4 sm:$0xff]  }
 0x202   :  { %v6179_v33 = vld [vmem:[#allocation10 + $0x218] ss:$12 sps:$4 sm:$0xff]  }
 0x203   :  { %3134 = vmatpush2.bf16.msra.mxu0 %v6106_v8  ;;  %v6176_v8 = vld [vmem:[#allocation7 + $0x260] ss:$48 sps:$4 sm:$0xff]  }
 0x204   :  { %3161 = vmatpush1.bf16.msra.mxu1 %v6109_v34  ;;  %3135 = vmatprep.subr.bf16.mxu0 %v6114_v35  ;;  %v6180_v34 = vld [vmem:[#allocation10 + $0x2c0] ss:$12 sps:$4 sm:$0xff]   ;;  %v6183_v35 = vld [vmem:[#allocation7 + $0x204] ss:$48 sps:$4 sm:$0xff]  }
 0x205   :  { %3162 = vmatprep.subr.bf16.mxu1 %v6117_v36  ;;  %v6184_v36 = vld [vmem:[#allocation10 + $0x200] ss:$12 sps:$4 sm:$0xff]  }
 0x207   :  { %3136 = vmatpush2.bf16.msra.mxu0 %v6112_v38  ;;  %v6181_v38 = vld [vmem:[#allocation7 + $0x200] ss:$48 sps:$4 sm:$0xff]  }
 0x208   :  { %3163 = vmatpush1.bf16.msra.mxu1 %v6115_v47  ;;  %3137 = vmatprep.subr.bf16.mxu0 %v6120_v39  ;;  %v6185_v47 = vld [vmem:[#allocation10 + $0x2a8] ss:$12 sps:$4 sm:$0xff]  }
 0x209   :  { %3164 = vmatprep.subr.bf16.mxu1 %v6123_v40  ;;  %v6189_v39 = vld [vmem:[#allocation10 + $0x1e8] ss:$12 sps:$4 sm:$0xff]   ;;  %v6190_v40 = vld [vmem:[#allocation10 + $0x290] ss:$12 sps:$4 sm:$0xff]  }
 0x20b   :  { %3138 = vmatpush2.bf16.msra.mxu0 %v6118_v42  ;;  %v6193_v42 = vld [vmem:[#allocation7 + $0x144] ss:$48 sps:$4 sm:$0xff]  }
 0x20c   :  { %3165 = vmatpush1.bf16.msra.mxu1 %v6121_v46  ;;  %3139 = vmatprep.subr.bf16.mxu0 %v6126_v49  ;;  %v6194_v46 = vld [vmem:[#allocation10 + $0x1d0] ss:$12 sps:$4 sm:$0xff]   ;;  %v6191_v49 = vld [vmem:[#allocation7 + $0x140] ss:$48 sps:$4 sm:$0xff]  }
 0x20d   :  { %3166 = vmatprep.subr.bf16.mxu1 %v6129_v50  ;;  %v6195_v50 = vld [vmem:[#allocation10 + $0x278] ss:$12 sps:$4 sm:$0xff]  }
 0x20f   :  { %3140 = vmatpush2.bf16.msra.mxu0 %v6124_v51  ;;  %v6198_v51 = vld [vmem:[#allocation7 + $0xe4] ss:$48 sps:$4 sm:$0xff]  }
 0x210   :  { %3167 = vmatpush1.bf16.msra.mxu1 %v6127_v52  ;;  %5541 = vmatprep.subr.bf16.mxu0 %v6133_v53  ;;  %v6199_v52 = vld [vmem:[#allocation10 + $0x1b8] ss:$12 sps:$4 sm:$0xff]   ;;  %v6200_v53 = vld [vmem:[#allocation10 + $0x260] ss:$12 sps:$4 sm:$0xff]  }
 0x211   :  { %3168 = vmatprep.subr.bf16.mxu1 %v6132_v43  ;;  %v6196_v43 = vld [vmem:[#allocation7 + $0xe0] ss:$48 sps:$4 sm:$0xff]  }
 0x212   :  { %3142 = vmatmul.mubr.bf16.vlgmr.msra.gmra.mxu0 %v6687_v41 }
 0x213   :  { %5542 = vmatpush3.bf16.msra.mxu0 %v6134_v56  ;;  %3227 = vmatprep.mubr.bf16.mxu0 %v6727_v26  ;;  %v6153_v26 = vld [vmem:[#allocation10 + $0x110] ss:$12 sps:$4 sm:$0xff]   ;;  %v6204_v56 = vld [vmem:[#allocation10 + $0x1a0] ss:$12 sps:$4 sm:$0xff]  }
 0x214   :  { %3169 = vmatpush2.bf16.msra.mxu1 %v6130_v55  ;;  %5543 = vmatprep.subr.bf16.mxu0 %v6138_v58  ;;  %v6203_v55 = vld [vmem:[#allocation7 + $0x84] ss:$48 sps:$4 sm:$0xff]  }
 0x215   :  { %3170 = vmatprep.subr.bf16.mxu1 %v6137_v57  ;;  %v6201_v57 = vld [vmem:[#allocation7 + $0x80] ss:$48 sps:$4 sm:$0xff]  }
 0x216   :  { %v6205_v58 = vld [vmem:[#allocation10 + $0x248] ss:$12 sps:$4 sm:$0xff]  }
 0x217   :  { %5544 = vmatpush3.bf16.msra.mxu0 %v6139_v60  ;;  %v6209_v60 = vld [vmem:[#allocation10 + $0x188] ss:$12 sps:$4 sm:$0xff]  }
 0x218   :  { %3171 = vmatpush2.bf16.msra.mxu1 %v6135_v59  ;;  %5545 = vmatprep.subr.bf16.mxu0 %v6143_v62  ;;  %v6208_v59 = vld [vmem:[#allocation7 + $0x24] ss:$48 sps:$4 sm:$0xff]  }
 0x219   :  { %3172 = vmatprep.subr.bf16.mxu1 %v6142_v61  ;;  %v6206_v61 = vld [vmem:[#allocation7 + $0x20] ss:$48 sps:$4 sm:$0xff]   ;;  %v6215_v62 = vld [vmem:[#allocation7 + $0x8c4] ss:$48 sps:$4 sm:$0xff]  }
 0x21b   :  { %5546 = vmatpush3.bf16.msra.mxu0 %v6144_v1  ;;  %v6213_v1 = vld [vmem:[#allocation7 + $0x8c0] ss:$48 sps:$4 sm:$0xff]  }
 0x21c   :  { %3173 = vmatpush2.bf16.msra.mxu1 %v6140_v63  ;;  %5547 = vmatprep.subr.bf16.mxu0 %v6148_v3  ;;  %v6212_v63 = vld [vmem:[#allocation7 + $0x5c4] ss:$48 sps:$4 sm:$0xff]  }
 0x21d   :  { %3174 = vmatprep.subr.bf16.mxu1 %v6147_v2  ;;  %v6210_v2 = vld [vmem:[#allocation7 + $0x5c0] ss:$48 sps:$4 sm:$0xff]   ;;  %v6221_v3 = vld [vmem:[#allocation7 + $0x864] ss:$48 sps:$4 sm:$0xff]  }
 0x21f   :  { %5548 = vmatpush3.bf16.msra.mxu0 %v6149_v5  ;;  %v6219_v5 = vld [vmem:[#allocation7 + $0x860] ss:$48 sps:$4 sm:$0xff]  }
 0x220   :  { %3175 = vmatpush2.bf16.msra.mxu1 %v6145_v4  ;;  %5549 = vmatprep.subr.bf16.mxu0 %v6153_v26  ;;  %v6218_v4 = vld [vmem:[#allocation7 + $0x564] ss:$48 sps:$4 sm:$0xff]  }
 0x221   :  { %3176 = vmatprep.subr.bf16.mxu1 %v6152_v6  ;;  %v6216_v6 = vld [vmem:[#allocation7 + $0x560] ss:$48 sps:$4 sm:$0xff]   ;;  %v6227_v26 = vld [vmem:[#allocation7 + $0x804] ss:$48 sps:$4 sm:$0xff]  }
 0x223   :  { %5550 = vmatpush3.bf16.msra.mxu0 %v6154_v11  ;;  %v6225_v11 = vld [vmem:[#allocation7 + $0x800] ss:$48 sps:$4 sm:$0xff]  }
 0x224   :  { %3177 = vmatpush2.bf16.msra.mxu1 %v6150_v9  ;;  %5551 = vmatprep.subr.bf16.mxu0 %v6158_v16  ;;  %v6224_v9 = vld [vmem:[#allocation7 + $0x504] ss:$48 sps:$4 sm:$0xff]  }
 0x225   :  { %3178 = vmatprep.subr.bf16.mxu1 %v6157_v17  ;;  %v6222_v17 = vld [vmem:[#allocation7 + $0x500] ss:$48 sps:$4 sm:$0xff]   ;;  %v6233_v16 = vld [vmem:[#allocation7 + $0x7a4] ss:$48 sps:$4 sm:$0xff]  }
 0x227   :  { %5552 = vmatpush3.bf16.msra.mxu0 %v6159_v19  ;;  %v6228_v19 = vld [vmem:[#allocation7 + $0x4a0] ss:$48 sps:$4 sm:$0xff]  }
 0x228   :  { %3179 = vmatpush2.bf16.msra.mxu1 %v6155_v18  ;;  %5553 = vmatprep.subr.bf16.mxu0 %v6163_v21  ;;  %v6230_v18 = vld [vmem:[#allocation7 + $0x4a4] ss:$48 sps:$4 sm:$0xff]  }
 0x229   :  { %3180 = vmatprep.subr.bf16.mxu1 %v6162_v20  ;;  %v6239_v20 = vld [vmem:[#allocation7 + $0x744] ss:$48 sps:$4 sm:$0xff]  }
 0x22a   :  { %v6236_v21 = vld [vmem:[#allocation7 + $0x444] ss:$48 sps:$4 sm:$0xff]  }
 0x22b   :  { %5554 = vmatpush3.bf16.msra.mxu0 %v6164_v22  ;;  %v6234_v22 = vld [vmem:[#allocation7 + $0x440] ss:$48 sps:$4 sm:$0xff]  }
 0x22c   :  { %3181 = vmatpush2.bf16.msra.mxu1 %v6160_v14  ;;  %5555 = vmatprep.subr.bf16.mxu0 %v6168_v24  ;;  %v6237_v14 = vld [vmem:[#allocation7 + $0x740] ss:$48 sps:$4 sm:$0xff]   ;;  %v6242_v24 = vld [vmem:[#allocation7 + $0x3e4] ss:$48 sps:$4 sm:$0xff]  }
 0x22d   :  { %3182 = vmatprep.subr.bf16.mxu1 %v6167_v23  ;;  %v6245_v23 = vld [vmem:[#allocation7 + $0x6e4] ss:$48 sps:$4 sm:$0xff]  }
 0x22f   :  { %5556 = vmatpush3.bf16.msra.mxu0 %v6169_v28  ;;  %v6240_v28 = vld [vmem:[#allocation7 + $0x3e0] ss:$48 sps:$4 sm:$0xff]  }
 0x230   :  { %3183 = vmatpush2.bf16.msra.mxu1 %v6165_v25  ;;  %3875 = vmatprep.subr.bf16.mxu0 %v6173_v29  ;;  %v6243_v25 = vld [vmem:[#allocation7 + $0x6e0] ss:$48 sps:$4 sm:$0xff]   ;;  %v6248_v29 = vld [vmem:[#allocation7 + $0x384] ss:$48 sps:$4 sm:$0xff]  }
 0x231   :  { %5563 = vmatprep.subr.bf16.mxu1 %v6170_v48  ;;  %v6251_v48 = vld [vmem:[#allocation7 + $0x684] ss:$48 sps:$4 sm:$0xff]  }
 0x232   :  { %3228 = vmatmul.mubr.bf16.vlgmr.msra.gmra.mxu0 %v6687_v41  ;;  %v6188_v41 = vld [vmem:[#allocation7 + $0x1a4] ss:$48 sps:$4 sm:$0xff]  }
 0x233   :  { %3185 = vmatmul.mubr.bf16.vlgmr.msra.gmra.mxu1 %v6703_v7  ;;  %3876 = vmatpush1.bf16.msra.mxu0 %v6171_v31  ;;  %v6246_v31 = vld [vmem:[#allocation7 + $0x380] ss:$48 sps:$4 sm:$0xff]  }
 0x234   :  { %5564 = vmatpush3.bf16.msra.mxu1 %v6174_v30  ;;  %3268 = vmatprep.mubr.bf16.mxu1 %v6705_v10  ;;  %v6186_v10 = vld [vmem:[#allocation7 + $0x1a0] ss:$48 sps:$4 sm:$0xff]  }
 0x235   :  { %5565 = vmatprep.subr.bf16.mxu1 %v6175_v32  ;;  %3877 = vmatprep.subr.bf16.mxu0 %v6178_v27  ;;  %v6249_v30 = vld [vmem:[#allocation7 + $0x680] ss:$48 sps:$4 sm:$0xff]   ;;  %v6257_v32 = vld [vmem:[#allocation7 + $0x624] ss:$48 sps:$4 sm:$0xff]  }
 0x236   :  { %3907 = vmatprep.mubr.bf16.mxu0 %v6656_v54  ;;  %v6254_v27 = vld [vmem:[#allocation7 + $0x324] ss:$48 sps:$4 sm:$0xff]  }
 0x237   :  { %3878 = vmatpush1.bf16.msra.mxu0 %v6176_v8  ;;  %v6252_v8 = vld [vmem:[#allocation7 + $0x320] ss:$48 sps:$4 sm:$0xff]  }
 0x238   :  { %5566 = vmatpush3.bf16.msra.mxu1 %v6179_v33  ;;  %3879 = vmatprep.subr.bf16.mxu0 %v6183_v35  ;;  %v6255_v33 = vld [vmem:[#allocation7 + $0x620] ss:$48 sps:$4 sm:$0xff]   ;;  %v6284_v35 = vld [vmem:[#allocation7 + $0x8cc] ss:$48 sps:$4 sm:$0xff]  }
 0x239   :  { %5567 = vmatprep.subr.bf16.mxu1 %v6180_v34  ;;  %v6260_v34 = vld [vmem:[#allocation7 + $0x2cc] ss:$48 sps:$4 sm:$0xff]  }
 0x23b   :  { %3880 = vmatpush1.bf16.msra.mxu0 %v6181_v38  ;;  %v6263_v38 = vld [vmem:[#allocation7 + $0x26c] ss:$48 sps:$4 sm:$0xff]  }
 0x23c   :  { %5568 = vmatpush3.bf16.msra.mxu1 %v6184_v36  ;;  %3881 = vmatprep.subr.bf16.mxu0 %v6188_v41  ;;  %v6258_v36 = vld [vmem:[#allocation7 + $0x2c8] ss:$48 sps:$4 sm:$0xff]   ;;  %v6290_v41 = vld [vmem:[#allocation7 + $0x86c] ss:$48 sps:$4 sm:$0xff]  }
 0x23d   :  { %5569 = vmatprep.subr.bf16.mxu1 %v6185_v47  ;;  %v6282_v47 = vld [vmem:[#allocation7 + $0x8c8] ss:$48 sps:$4 sm:$0xff]  }
 0x23f   :  { %3882 = vmatpush1.bf16.msra.mxu0 %v6186_v10  ;;  %v6266_v10 = vld [vmem:[#allocation7 + $0x20c] ss:$48 sps:$4 sm:$0xff]  }
 0x240   :  { %5570 = vmatpush3.bf16.msra.mxu1 %v6189_v39  ;;  %3883 = vmatprep.subr.bf16.mxu0 %v6193_v42  ;;  %v6261_v39 = vld [vmem:[#allocation7 + $0x268] ss:$48 sps:$4 sm:$0xff]   ;;  %v6296_v42 = vld [vmem:[#allocation7 + $0x80c] ss:$48 sps:$4 sm:$0xff]  }
 0x241   :  { %5571 = vmatprep.subr.bf16.mxu1 %v6190_v40  ;;  %v6288_v40 = vld [vmem:[#allocation7 + $0x868] ss:$48 sps:$4 sm:$0xff]  }
 0x243   :  { %3884 = vmatpush1.bf16.msra.mxu0 %v6191_v49  ;;  %v6269_v49 = vld [vmem:[#allocation7 + $0x1ac] ss:$48 sps:$4 sm:$0xff]  }
 0x244   :  { %5572 = vmatpush3.bf16.msra.mxu1 %v6194_v46  ;;  %3885 = vmatprep.subr.bf16.mxu0 %v6198_v51  ;;  %v6264_v46 = vld [vmem:[#allocation7 + $0x208] ss:$48 sps:$4 sm:$0xff]   ;;  %v6302_v51 = vld [vmem:[#allocation7 + $0x7ac] ss:$48 sps:$4 sm:$0xff]  }
 0x245   :  { %5573 = vmatprep.subr.bf16.mxu1 %v6195_v50  ;;  %v6294_v50 = vld [vmem:[#allocation7 + $0x808] ss:$48 sps:$4 sm:$0xff]  }
 0x247   :  { %3886 = vmatpush1.bf16.msra.mxu0 %v6196_v43  ;;  %v6272_v43 = vld [vmem:[#allocation7 + $0x14c] ss:$48 sps:$4 sm:$0xff]  }
 0x248   :  { %5574 = vmatpush3.bf16.msra.mxu1 %v6199_v52  ;;  %3887 = vmatprep.subr.bf16.mxu0 %v6203_v55  ;;  %v6267_v52 = vld [vmem:[#allocation7 + $0x1a8] ss:$48 sps:$4 sm:$0xff]   ;;  %v6308_v55 = vld [vmem:[#allocation7 + $0x74c] ss:$48 sps:$4 sm:$0xff]  }
 0x249   :  { %5575 = vmatprep.subr.bf16.mxu1 %v6200_v53  ;;  %v6300_v53 = vld [vmem:[#allocation7 + $0x7a8] ss:$48 sps:$4 sm:$0xff]  }
 0x24b   :  { %3888 = vmatpush1.bf16.msra.mxu0 %v6201_v57  ;;  %v6314_v57 = vld [vmem:[#allocation7 + $0x6ec] ss:$48 sps:$4 sm:$0xff]  }
 0x24c   :  { %5576 = vmatpush3.bf16.msra.mxu1 %v6204_v56  ;;  %3889 = vmatprep.subr.bf16.mxu0 %v6208_v59  ;;  %v6306_v56 = vld [vmem:[#allocation7 + $0x748] ss:$48 sps:$4 sm:$0xff]  }
 0x24d   :  { %5577 = vmatprep.subr.bf16.mxu1 %v6205_v58  ;;  %v6273_v58 = vld [vmem:[#allocation7 + $0xe8] ss:$48 sps:$4 sm:$0xff]  }
 0x24f   :  { %3890 = vmatpush1.bf16.msra.mxu0 %v6206_v61  ;;  %v6312_v61 = vld [vmem:[#allocation7 + $0x6e8] ss:$48 sps:$4 sm:$0xff]  }
 0x250   :  { %5578 = vmatpush3.bf16.msra.mxu1 %v6209_v60  ;;  %3891 = vmatprep.subr.bf16.mxu0 %v6212_v63  ;;  %v6278_v60 = vld [vmem:[#allocation7 + $0x8c] ss:$48 sps:$4 sm:$0xff]   ;;  %v6276_v63 = vld [vmem:[#allocation7 + $0x88] ss:$48 sps:$4 sm:$0xff]  }
 0x251   :  { %3918 = vmatprep.subr.bf16.mxu1 %v6215_v62  ;;  %v6320_v62 = vld [vmem:[#allocation7 + $0x68c] ss:$48 sps:$4 sm:$0xff]  }
 0x253   :  { %3269 = vmatmul.mubr.bf16.vlgmr.msra.gmra.mxu1 %v6703_v7  ;;  %3892 = vmatpush2.bf16.msra.mxu0 %v6210_v2  ;;  %v6231_v7 = vld [vmem:[#allocation7 + $0x7a0] ss:$48 sps:$4 sm:$0xff]   ;;  %v6281_v2 = vld [vmem:[#allocation7 + $0x2c] ss:$48 sps:$4 sm:$0xff]  }
 0x254   :  { %3919 = vmatpush1.bf16.msra.mxu1 %v6213_v1  ;;  %3950 = vmatprep.mubr.bf16.mxu1 %v6597_v0 }
 0x255   :  { %3920 = vmatprep.subr.bf16.mxu1 %v6221_v3  ;;  %3893 = vmatprep.subr.bf16.mxu0 %v6218_v4  ;;  %v6318_v3 = vld [vmem:[#allocation7 + $0x688] ss:$48 sps:$4 sm:$0xff]   ;;  %v6326_v4 = vld [vmem:[#allocation7 + $0x62c] ss:$48 sps:$4 sm:$0xff]  }
 0x257   :  { %3894 = vmatpush2.bf16.msra.mxu0 %v6216_v6 }
 0x258   :  { %3921 = vmatpush1.bf16.msra.mxu1 %v6219_v5  ;;  %3895 = vmatprep.subr.bf16.mxu0 %v6224_v9  ;;  %v6279_v5 = vld [vmem:[#allocation7 + $0x28] ss:$48 sps:$4 sm:$0xff]  }
 0x259   :  { %3922 = vmatprep.subr.bf16.mxu1 %v6227_v26  ;;  %v6287_v26 = vld [vmem:[#allocation7 + $0x5cc] ss:$48 sps:$4 sm:$0xff]   ;;  %v6324_v9 = vld [vmem:[#allocation7 + $0x628] ss:$48 sps:$4 sm:$0xff]  }
 0x25b   :  { %3896 = vmatpush2.bf16.msra.mxu0 %v6222_v17  ;;  %v6285_v17 = vld [vmem:[#allocation7 + $0x5c8] ss:$48 sps:$4 sm:$0xff]  }
 0x25c   :  { %3923 = vmatpush1.bf16.msra.mxu1 %v6225_v11  ;;  %3897 = vmatprep.subr.bf16.mxu0 %v6230_v18  ;;  %v6332_v11 = vld [vmem:[#allocation10 + $0x6ac] ss:$12 sps:$4 sm:$0xff]   ;;  %v6293_v18 = vld [vmem:[#allocation7 + $0x56c] ss:$48 sps:$4 sm:$0xff]  }
 0x25d   :  { %3924 = vmatprep.subr.bf16.mxu1 %v6233_v16 }
 0x25f   :  { %3898 = vmatpush2.bf16.msra.mxu0 %v6228_v19  ;;  %v6335_v19 = vld [vmem:[#allocation10 + $0x694] ss:$12 sps:$4 sm:$0xff]  }
 0x260   :  { %3925 = vmatpush1.bf16.msra.mxu1 %v6231_v7  ;;  %3899 = vmatprep.subr.bf16.mxu0 %v6236_v21  ;;  %v6330_v7 = vld [vmem:[#allocation10 + $0x6a8] ss:$12 sps:$4 sm:$0xff]  }
 0x261   :  { %3926 = vmatprep.subr.bf16.mxu1 %v6239_v20 }
 0x263   :  { %3900 = vmatpush2.bf16.msra.mxu0 %v6234_v22  ;;  %v6291_v22 = vld [vmem:[#allocation7 + $0x568] ss:$48 sps:$4 sm:$0xff]  }
 0x264   :  { %3927 = vmatpush1.bf16.msra.mxu1 %v6237_v14  ;;  %3901 = vmatprep.subr.bf16.mxu0 %v6242_v24 }
 0x265   :  { %3928 = vmatprep.subr.bf16.mxu1 %v6245_v23 }
 0x267   :  { %3902 = vmatpush2.bf16.msra.mxu0 %v6240_v28  ;;  %v6333_v28 = vld [vmem:[#allocation10 + $0x690] ss:$12 sps:$4 sm:$0xff]  }
 0x268   :  { %3929 = vmatpush1.bf16.msra.mxu1 %v6243_v25  ;;  %3903 = vmatprep.subr.bf16.mxu0 %v6248_v29  ;;  %v6299_v25 = vld [vmem:[#allocation7 + $0x50c] ss:$48 sps:$4 sm:$0xff]  }
 0x269   :  { %3930 = vmatprep.subr.bf16.mxu1 %v6251_v48 }
 0x26b   :  { %3904 = vmatpush2.bf16.msra.mxu0 %v6246_v31 }
 0x26c   :  { %3931 = vmatpush1.bf16.msra.mxu1 %v6249_v30  ;;  %3905 = vmatprep.subr.bf16.mxu0 %v6254_v27  ;;  %v6338_v30 = vld [vmem:[#allocation10 + $0x67c] ss:$12 sps:$4 sm:$0xff]  }
 0x26d   :  { %3932 = vmatprep.subr.bf16.mxu1 %v6257_v32 }
 0x26f   :  { %3906 = vmatpush2.bf16.msra.mxu0 %v6252_v8 }
 0x270   :  { %3933 = vmatpush1.bf16.msra.mxu1 %v6255_v33  ;;  %4004 = vmatprep.subr.bf16.mxu0 %v6284_v35  ;;  %v6297_v33 = vld [vmem:[#allocation7 + $0x508] ss:$48 sps:$4 sm:$0xff]   ;;  %v6336_v35 = vld [vmem:[#allocation10 + $0x678] ss:$12 sps:$4 sm:$0xff]  }
 0x271   :  { %3961 = vmatprep.subr.bf16.mxu1 %v6260_v34  ;;  %v6305_v34 = vld [vmem:[#allocation7 + $0x4ac] ss:$48 sps:$4 sm:$0xff]  }
 0x272   :  { %3908 = vmatmul.mubr.bf16.vlgmr.msra.gmra.mxu0 %v6660_v12  ;;  %v2463_v59 = vpop.f32.mrf.mxu0 }
 0x273   :  { %3951 = vmatmul.mubr.bf16.vlgmr.msra.gmra.mxu1 %v6653_v37  ;;  %4005 = vmatpush1.bf16.msra.mxu0 %v6282_v47  ;;  %v6341_v47 = vld [vmem:[#allocation10 + $0x664] ss:$12 sps:$4 sm:$0xff]  }
 0x274   :  { %3962 = vmatpush1.bf16.msra.mxu1 %v6258_v36  ;;  %4006 = vmatprep.subr.bf16.mxu0 %v6290_v41  ;;  %v2465_v1 = vpop.f32.mrf.mxu0  ;;  %v6303_v41 = vld [vmem:[#allocation7 + $0x4a8] ss:$48 sps:$4 sm:$0xff]  }
 0x275   :  { %3963 = vmatprep.subr.bf16.mxu1 %v6263_v38  ;;  %4036 = vmatprep.mubr.bf16.mxu0 %v6597_v0  ;;  %v6270_v0 = vld [vmem:[#allocation7 + $0x148] ss:$48 sps:$4 sm:$0xff]  }
 0x276   :  { %3993 = vmatprep.mubr.bf16.mxu1 %v6656_v54  ;;  %v6275_v54 = vld [vmem:[#allocation7 + $0xec] ss:$48 sps:$4 sm:$0xff]   ;;  %v2467_v6 = vpop.f32.mrf.mxu0 }
 0x277   :  { %4007 = vmatpush1.bf16.msra.mxu0 %v6288_v40  ;;  %v6344_v40 = vld [vmem:[#allocation10 + $0x64c] ss:$12 sps:$4 sm:$0xff]  }
 0x278   :  { %3964 = vmatpush1.bf16.msra.mxu1 %v6261_v39  ;;  %4008 = vmatprep.subr.bf16.mxu0 %v6296_v42  ;;  %v2469_v16 = vpop.f32.mrf.mxu0  ;;  %v6311_v39 = vld [vmem:[#allocation7 + $0x44c] ss:$48 sps:$4 sm:$0xff]   ;;  %v6309_v42 = vld [vmem:[#allocation7 + $0x448] ss:$48 sps:$4 sm:$0xff]  }
 0x279   :  { %3965 = vmatprep.subr.bf16.mxu1 %v6266_v10  ;;  %v6339_v10 = vld [vmem:[#allocation10 + $0x660] ss:$12 sps:$4 sm:$0xff]  }
 0x27b   :  { %4009 = vmatpush1.bf16.msra.mxu0 %v6294_v50  ;;  %v6347_v50 = vld [vmem:[#allocation10 + $0x634] ss:$12 sps:$4 sm:$0xff]  }
 0x27c   :  { %3966 = vmatpush1.bf16.msra.mxu1 %v6264_v46  ;;  %4010 = vmatprep.subr.bf16.mxu0 %v6302_v51  ;;  %v6317_v46 = vld [vmem:[#allocation7 + $0x3ec] ss:$48 sps:$4 sm:$0xff]   ;;  %v6315_v51 = vld [vmem:[#allocation7 + $0x3e8] ss:$48 sps:$4 sm:$0xff]  }
 0x27d   :  { %3967 = vmatprep.subr.bf16.mxu1 %v6269_v49  ;;  %v6342_v49 = vld [vmem:[#allocation10 + $0x648] ss:$12 sps:$4 sm:$0xff]  }
 0x27f   :  { %4011 = vmatpush1.bf16.msra.mxu0 %v6300_v53  ;;  %v6350_v53 = vld [vmem:[#allocation10 + $0x61c] ss:$12 sps:$4 sm:$0xff]  }
 0x280   :  { %3968 = vmatpush1.bf16.msra.mxu1 %v6267_v52  ;;  %4012 = vmatprep.subr.bf16.mxu0 %v6308_v55  ;;  %v6323_v52 = vld [vmem:[#allocation7 + $0x38c] ss:$48 sps:$4 sm:$0xff]   ;;  %v6321_v55 = vld [vmem:[#allocation7 + $0x388] ss:$48 sps:$4 sm:$0xff]  }
 0x281   :  { %3969 = vmatprep.subr.bf16.mxu1 %v6272_v43  ;;  %v6345_v43 = vld [vmem:[#allocation10 + $0x630] ss:$12 sps:$4 sm:$0xff]  }
 0x283   :  { %4013 = vmatpush1.bf16.msra.mxu0 %v6306_v56  ;;  %v6353_v56 = vld [vmem:[#allocation10 + $0x604] ss:$12 sps:$4 sm:$0xff]  }
 0x284   :  { %3970 = vmatpush1.bf16.msra.mxu1 %v6270_v0  ;;  %4014 = vmatprep.subr.bf16.mxu0 %v6314_v57  ;;  %v6329_v0 = vld [vmem:[#allocation7 + $0x32c] ss:$48 sps:$4 sm:$0xff]   ;;  %v6327_v57 = vld [vmem:[#allocation7 + $0x328] ss:$48 sps:$4 sm:$0xff]  }
 0x285   :  { %3971 = vmatprep.subr.bf16.mxu1 %v6275_v54  ;;  %v6348_v54 = vld [vmem:[#allocation10 + $0x618] ss:$12 sps:$4 sm:$0xff]  }
 0x287   :  { %4015 = vmatpush1.bf16.msra.mxu0 %v6312_v61  ;;  %v6359_v61 = vld [vmem:[#allocation10 + $0x754] ss:$12 sps:$4 sm:$0xff]  }
 0x288   :  { %3972 = vmatpush1.bf16.msra.mxu1 %v6273_v58  ;;  %4016 = vmatprep.subr.bf16.mxu0 %v6320_v62  ;;  %v6351_v58 = vld [vmem:[#allocation10 + $0x600] ss:$12 sps:$4 sm:$0xff]  }
 0x289   :  { %3973 = vmatprep.subr.bf16.mxu1 %v6278_v60  ;;  %v6354_v60 = vld [vmem:[#allocation10 + $0x768] ss:$12 sps:$4 sm:$0xff]  }
 0x28b   :  { %4017 = vmatpush1.bf16.msra.mxu0 %v6318_v3  ;;  %v6362_v3 = vld [vmem:[#allocation10 + $0x73c] ss:$12 sps:$4 sm:$0xff]  }
 0x28c   :  { %3974 = vmatpush1.bf16.msra.mxu1 %v6276_v63  ;;  %4018 = vmatprep.subr.bf16.mxu0 %v6326_v4 }
 0x28d   :  { %3975 = vmatprep.subr.bf16.mxu1 %v6281_v2 }
 0x28f   :  { %4019 = vmatpush1.bf16.msra.mxu0 %v6324_v9 }
 0x290   :  { %3976 = vmatpush1.bf16.msra.mxu1 %v6279_v5  ;;  %4699 = vmatprep.subr.bf16.mxu0 %v6332_v11  ;;  %v6365_v11 = vld [vmem:[#allocation10 + $0x724] ss:$12 sps:$4 sm:$0xff]  }
 0x291   :  { %3977 = vmatprep.subr.bf16.mxu1 %v6287_v26  ;;  %v6360_v26 = vld [vmem:[#allocation10 + $0x738] ss:$12 sps:$4 sm:$0xff]  }
 0x292   :  { %v5513_v20 = vpop.f32.mrf.mxu0  ;;  %4037 = vmatmul.mubr.bf16.vlgmr.msra.gmra.mxu0 %v6653_v37 }
 0x293   :  { %v2506_v21 = vpop.f32.mrf.mxu1  ;;  %4700 = vmatpush1.bf16.msra.mxu0 %v6330_v7  ;;  %v6380_v7 = vld [vmem:[#allocation10 + $0x82c] ss:$12 sps:$4 sm:$0xff]  }
 0x294   :  { %v6744_v14 = vadd.f32 %v2506_v21, %v2463_v59  ;;  %3978 = vmatpush2.bf16.msra.mxu1 %v6285_v17  ;;  %v5514_v23 = vpop.f32.mrf.mxu0  ;;  %4701 = vmatprep.subr.bf16.mxu0 %v6335_v19  ;;  %v6356_v59 = vld [vmem:[#allocation10 + $0x76c] ss:$12 sps:$4 sm:$0xff]   ;;  %v6371_v19 = vld [vmem:[#allocation10 + $0x6f4] ss:$12 sps:$4 sm:$0xff]   ;;  %v6369_v21 = vld [vmem:[#allocation10 + $0x6f0] ss:$12 sps:$4 sm:$0xff]  }
 0x295   :  { %v2508_v24 = vpop.f32.mrf.mxu1  ;;  %3979 = vmatprep.subr.bf16.mxu1 %v6293_v18  ;;  %v6747_v48 = vadd.f32 %v5514_v23, %v5513_v20  ;;  %v6366_v18 = vld [vmem:[#allocation10 + $0x708] ss:$12 sps:$4 sm:$0xff]  }
 0x296   :  { %v6749_v29 = vadd.f32 %v2508_v24, %v2465_v1  ;;  %v5516_v31 = vpop.f32.mrf.mxu0  ;;  %v6357_v1 = vld [vmem:[#allocation10 + $0x750] ss:$12 sps:$4 sm:$0xff]   ;;  %v6378_v20 = vld [vmem:[#allocation10 + $0x828] ss:$12 sps:$4 sm:$0xff]  }
 0x297   :  { %v2510_v32 = vpop.f32.mrf.mxu1  ;;  %4702 = vmatpush1.bf16.msra.mxu0 %v6333_v28  ;;  %v6385_v23 = vld [vmem:[#allocation10 + $0x814] ss:$12 sps:$4 sm:$0xff]   ;;  %v6374_v24 = vld [vmem:[#allocation10 + $0x6dc] ss:$12 sps:$4 sm:$0xff]   ;;  %v6388_v28 = vld [vmem:[#allocation10 + $0x7f8] ss:$12 sps:$4 sm:$0xff]  }
 0x298   :  { %v6751_v27 = vadd.f32 %v2510_v32, %v2467_v6  ;;  %3980 = vmatpush2.bf16.msra.mxu1 %v6291_v22  ;;  %v5517_v8 = vpop.f32.mrf.mxu0  ;;  %4703 = vmatprep.subr.bf16.mxu0 %v6338_v30  ;;  %v6383_v22 = vld [vmem:[#allocation10 + $0x810] ss:$12 sps:$4 sm:$0xff]   ;;  %v6393_v32 = vld [vmem:[#allocation10 + $0x7e0] ss:$12 sps:$4 sm:$0xff]  }
 0x299   :  { %v2512_v37 = vpop.f32.mrf.mxu1  ;;  %3981 = vmatprep.subr.bf16.mxu1 %v6299_v25  ;;  %v6753_v36 = vadd.f32 %v5517_v8, %v5516_v31  ;;  %v6372_v25 = vld [vmem:[#allocation10 + $0x6d8] ss:$12 sps:$4 sm:$0xff]   ;;  %v6375_v31 = vld [vmem:[#allocation10 + $0x6c0] ss:$12 sps:$4 sm:$0xff]   ;;  %v6381_v8 = vld [vmem:[#allocation10 + $0x770] ss:$12 sps:$4 sm:$0xff]  }
 0x29a   :  { %v6755_v38 = vadd.f32 %v2512_v37, %v2469_v16  ;;  %v6368_v16 = vld [vmem:[#allocation10 + $0x70c] ss:$12 sps:$4 sm:$0xff]   ;;  %v6377_v30 = vld [vmem:[#allocation10 + $0x6c4] ss:$12 sps:$4 sm:$0xff]   ;;  %v6398_v37 = vld [vmem:[#allocation10 + $0x7c8] ss:$12 sps:$4 sm:$0xff]  }
 0x29b   :  { %4704 = vmatpush1.bf16.msra.mxu0 %v6336_v35 }
 0x29c   :  { %3982 = vmatpush2.bf16.msra.mxu1 %v6297_v33  ;;  %4705 = vmatprep.subr.bf16.mxu0 %v6341_v47  ;;  %v6395_v33 = vld [vmem:[#allocation10 + $0x7e4] ss:$12 sps:$4 sm:$0xff]  }
 0x29d   :  { %3983 = vmatprep.subr.bf16.mxu1 %v6305_v34  ;;  %v6400_v34 = vld [vmem:[#allocation10 + $0x7cc] ss:$12 sps:$4 sm:$0xff]  }
 0x29f   :  { %4706 = vmatpush1.bf16.msra.mxu0 %v6339_v10 }
 0x2a0   :  { %3984 = vmatpush2.bf16.msra.mxu1 %v6303_v41  ;;  %4707 = vmatprep.subr.bf16.mxu0 %v6344_v40  ;;  %v6403_v41 = vld [vmem:[#allocation10 + $0x7b0] ss:$12 sps:$4 sm:$0xff]  }
 0x2a1   :  { %3985 = vmatprep.subr.bf16.mxu1 %v6311_v39  ;;  %v6405_v39 = vld [vmem:[#allocation10 + $0x7b4] ss:$12 sps:$4 sm:$0xff]  }
 0x2a3   :  { %4708 = vmatpush1.bf16.msra.mxu0 %v6342_v49  ;;  %v6408_v49 = vld [vmem:[#allocation10 + $0x798] ss:$12 sps:$4 sm:$0xff]  }
 0x2a4   :  { %3986 = vmatpush2.bf16.msra.mxu1 %v6309_v42  ;;  %4709 = vmatprep.subr.bf16.mxu0 %v6347_v50  ;;  %v6410_v50 = vld [vmem:[#allocation10 + $0x79c] ss:$12 sps:$4 sm:$0xff]  }
 0x2a5   :  { %3987 = vmatprep.subr.bf16.mxu1 %v6317_v46 }
 0x2a7   :  { %4710 = vmatpush1.bf16.msra.mxu0 %v6345_v43  ;;  %v6418_v43 = vld [vmem:[#allocation10 + $0x8e8] ss:$12 sps:$4 sm:$0xff]  }
 0x2a8   :  { %3988 = vmatpush2.bf16.msra.mxu1 %v6315_v51  ;;  %4711 = vmatprep.subr.bf16.mxu0 %v6350_v53  ;;  %v6420_v53 = vld [vmem:[#allocation10 + $0x8ec] ss:$12 sps:$4 sm:$0xff]  }
 0x2a9   :  { %3989 = vmatprep.subr.bf16.mxu1 %v6323_v52  ;;  %v6413_v52 = vld [vmem:[#allocation10 + $0x780] ss:$12 sps:$4 sm:$0xff]  }
 0x2ab   :  { %4712 = vmatpush1.bf16.msra.mxu0 %v6348_v54  ;;  %v6429_v54 = vld [vmem:[#allocation10 + $0x8a4] ss:$12 sps:$4 sm:$0xff]  }
 0x2ac   :  { %3990 = vmatpush2.bf16.msra.mxu1 %v6321_v55  ;;  %4713 = vmatprep.subr.bf16.mxu0 %v6353_v56  ;;  %v6423_v55 = vld [vmem:[#allocation10 + $0x8d4] ss:$12 sps:$4 sm:$0xff]   ;;  %v6432_v56 = vld [vmem:[#allocation10 + $0x88c] ss:$12 sps:$4 sm:$0xff]  }
 0x2ad   :  { %3991 = vmatprep.subr.bf16.mxu1 %v6329_v0  ;;  %v6426_v0 = vld [vmem:[#allocation10 + $0x8bc] ss:$12 sps:$4 sm:$0xff]  }
 0x2af   :  { %4714 = vmatpush1.bf16.msra.mxu0 %v6351_v58 }
 0x2b0   :  { %3992 = vmatpush2.bf16.msra.mxu1 %v6327_v57  ;;  %4715 = vmatprep.subr.bf16.mxu0 %v6356_v59  ;;  %v6430_v57 = vld [vmem:[#allocation10 + $0x888] ss:$12 sps:$4 sm:$0xff]  }
 0x2b1   :  { %4742 = vmatprep.subr.bf16.mxu1 %v6380_v7  ;;  %v6438_v7 = vld [vmem:[#allocation10 + $0x85c] ss:$12 sps:$4 sm:$0xff]  }
 0x2b3   :  { %v5535_v62 = vpop.f32.mrf.mxu1  ;;  %3994 = vmatmul.mubr.bf16.vlgmr.msra.gmra.mxu1 %v6660_v12  ;;  %4716 = vmatpush2.bf16.msra.mxu0 %v6354_v60  ;;  %v6363_v12 = vld [vmem:[#allocation10 + $0x720] ss:$12 sps:$4 sm:$0xff]  }
 0x2b4   :  { %4717 = vmatprep.subr.bf16.mxu0 %v6359_v61  ;;  %4743 = vmatpush1.bf16.msra.mxu1 %v6378_v20 }
 0x2b5   :  { %v5536_v63 = vpop.f32.mrf.mxu1  ;;  %4744 = vmatprep.subr.bf16.mxu1 %v6385_v23 }
 0x2b6   :  { %v5537_v2 = vadd.f32 %v5536_v63, %v5535_v62 }
 0x2b7   :  { %v5538_v4 = vpop.f32.mrf.mxu1  ;;  %4718 = vmatpush2.bf16.msra.mxu0 %v6357_v1 }
 0x2b8   :  { %v6759_v5 = vadd.f32 %v5537_v2, %v6747_v48  ;;  %4719 = vmatprep.subr.bf16.mxu0 %v6362_v3  ;;  %4745 = vmatpush1.bf16.msra.mxu1 %v6383_v22  ;;  %v6390_v48 = vld [vmem:[#allocation10 + $0x7fc] ss:$12 sps:$4 sm:$0xff]   ;;  %v6435_v2 = vld [vmem:[#allocation10 + $0x874] ss:$12 sps:$4 sm:$0xff]   ;;  %v6441_v22 = vld [vmem:[#allocation10 + $0x844] ss:$12 sps:$4 sm:$0xff]  }
 0x2b9   :  { %v5539_v6 = vpop.f32.mrf.mxu1  ;;  %4746 = vmatprep.subr.bf16.mxu1 %v6390_v48 }
 0x2ba   :  { %v5540_v9 = vadd.f32 %v5539_v6, %v5538_v4  ;;  %v6433_v6 = vld [vmem:[#allocation10 + $0x870] ss:$12 sps:$4 sm:$0xff]  }
 0x2bb   :  { %4720 = vmatpush2.bf16.msra.mxu0 %v6360_v26 }
 0x2bc   :  { %v6762_v17 = vadd.f32 %v5540_v9, %v6753_v36  ;;  %4721 = vmatprep.subr.bf16.mxu0 %v6365_v11  ;;  %4747 = vmatpush1.bf16.msra.mxu1 %v6388_v28 }
 0x2bd   :  { %4748 = vmatprep.subr.bf16.mxu1 %v6395_v33  ;;  %v3373_v33 = vld [vmem:[#allocation9 + $0x8] sm:$0xf] }
 0x2bf   :  { %4722 = vmatpush2.bf16.msra.mxu0 %v6363_v12 }
 0x2c0   :  { %4723 = vmatprep.subr.bf16.mxu0 %v6368_v16  ;;  %4749 = vmatpush1.bf16.msra.mxu1 %v6393_v32 }
 0x2c1   :  { %4750 = vmatprep.subr.bf16.mxu1 %v6400_v34 }
 0x2c3   :  { %4724 = vmatpush2.bf16.msra.mxu0 %v6366_v18 }
 0x2c4   :  { %4725 = vmatprep.subr.bf16.mxu0 %v6371_v19  ;;  %4751 = vmatpush1.bf16.msra.mxu1 %v6398_v37  ;;  %v6436_v19 = vld [vmem:[#allocation10 + $0x858] ss:$12 sps:$4 sm:$0xff]   ;;  %v3378_v37 = vrot.slane %v3373_v33, %v6679_v15 }
 0x2c5   :  { %4752 = vmatprep.subr.bf16.mxu1 %v6405_v39 }
 0x2c7   :  { %4726 = vmatpush2.bf16.msra.mxu0 %v6369_v21  ;;  %v6439_v21 = vld [vmem:[#allocation10 + $0x840] ss:$12 sps:$4 sm:$0xff]  }
 0x2c8   :  { %4727 = vmatprep.subr.bf16.mxu0 %v6374_v24  ;;  %4753 = vmatpush1.bf16.msra.mxu1 %v6403_v41 }
 0x2c9   :  { %4754 = vmatprep.subr.bf16.mxu1 %v6410_v50 }
 0x2cb   :  { %4728 = vmatpush2.bf16.msra.mxu0 %v6372_v25 }
 0x2cc   :  { %4729 = vmatprep.subr.bf16.mxu0 %v6377_v30  ;;  %4755 = vmatpush1.bf16.msra.mxu1 %v6408_v49 }
 0x2cf   :  { %4730 = vmatpush2.bf16.msra.mxu0 %v6375_v31 }
 0x2d0   :  { %5585 = vmatprep.subr.bf16.mxu0 %v6381_v8  ;;  %v3382_v8 = vrot.slane %v3373_v33, %v6708_v13 }
 0x2d2   :  { %v3143_v35 = vpop.f32.mrf.mxu0 }
 0x2d3   :  { %v3144_v36 = vadd.f32 %v3143_v35, %v6744_v14  ;;  %v6415_v14 = vld [vmem:[#allocation10 + $0x784] ss:$12 sps:$4 sm:$0xff]  }
 0x2d4   :  { %v3145_v47 = vpop.f32.mrf.mxu0  ;;  %4756 = vmatprep.subr.bf16.mxu1 %v6415_v14 }
 0x2d5   :  { %v3146_v10 = vadd.f32 %v3145_v47, %v6749_v29  ;;  %4757 = vmatpush1.bf16.msra.mxu1 %v6413_v52  ;;  %v6421_v29 = vld [vmem:[#allocation10 + $0x8d0] ss:$12 sps:$4 sm:$0xff]  }
 0x2d6   :  { %v3147_v40 = vpop.f32.mrf.mxu0  ;;  %4758 = vmatprep.subr.bf16.mxu1 %v6420_v53 }
 0x2d7   :  { %v3148_v42 = vadd.f32 %v3147_v40, %v6751_v27  ;;  %v6424_v27 = vld [vmem:[#allocation10 + $0x8b8] ss:$12 sps:$4 sm:$0xff]  }
 0x2d8   :  { %v3149_v46 = vpop.f32.mrf.mxu0 }
 0x2d9   :  { %v3150_v51 = vadd.f32 %v3149_v46, %v6755_v38  ;;  %4759 = vmatpush2.bf16.msra.mxu1 %v6418_v43  ;;  %v6427_v38 = vld [vmem:[#allocation10 + $0x8a0] ss:$12 sps:$4 sm:$0xff]  }
 0x2da   :  { %4760 = vmatprep.subr.bf16.mxu1 %v6423_v55 }
 0x2dd   :  { %4761 = vmatpush2.bf16.msra.mxu1 %v6421_v29 }
 0x2de   :  { %4762 = vmatprep.subr.bf16.mxu1 %v6426_v0 }
 0x2e1   :  { %4763 = vmatpush2.bf16.msra.mxu1 %v6424_v27  ;;  %v6382_v27 = vld [vmem:[#allocation10 + $0x6b0] ss:$12 sps:$4 sm:$0xff]  }
 0x2e2   :  { %4764 = vmatprep.subr.bf16.mxu1 %v6429_v54 }
 0x2e5   :  { %4765 = vmatpush2.bf16.msra.mxu1 %v6427_v38  ;;  %v6386_v38 = vld [vmem:[#allocation10 + $0x758] ss:$12 sps:$4 sm:$0xff]  }
 0x2e6   :  { %4766 = vmatprep.subr.bf16.mxu1 %v6432_v56  ;;  %v6387_v56 = vld [vmem:[#allocation10 + $0x698] ss:$12 sps:$4 sm:$0xff]  }
 0x2e9   :  { %4767 = vmatpush2.bf16.msra.mxu1 %v6430_v57  ;;  %v6391_v57 = vld [vmem:[#allocation10 + $0x740] ss:$12 sps:$4 sm:$0xff]  }
 0x2ea   :  { %4768 = vmatprep.subr.bf16.mxu1 %v6435_v2  ;;  %v6406_v2 = vld [vmem:[#allocation10 + $0x6f8] ss:$12 sps:$4 sm:$0xff]  }
 0x2ed   :  { %4769 = vmatpush2.bf16.msra.mxu1 %v6433_v6  ;;  %v6412_v6 = vld [vmem:[#allocation10 + $0x620] ss:$12 sps:$4 sm:$0xff]  }
 0x2ee   :  { %4770 = vmatprep.subr.bf16.mxu1 %v6438_v7 }
 0x2f1   :  { %4771 = vmatpush2.bf16.msra.mxu1 %v6436_v19  ;;  %v3386_v19 = vrot.slane %v3373_v33, %v6690_v44 }
 0x2f2   :  { %v5557_v59 = vpop.f32.mrf.mxu0  ;;  %4772 = vmatprep.subr.bf16.mxu1 %v6441_v22 }
 0x2f3   :  { %v3186_v58 = vpop.f32.mrf.mxu1 }
 0x2f4   :  { %v6768_v60 = vadd.f32 %v3186_v58, %v3144_v36  ;;  %v5558_v62 = vpop.f32.mrf.mxu0  ;;  %v6392_v58 = vld [vmem:[#allocation10 + $0x680] ss:$12 sps:$4 sm:$0xff]  }
 0x2f5   :  { %v3188_v61 = vpop.f32.mrf.mxu1  ;;  %v5559_v1 = vadd.f32 %v5558_v62, %v5557_v59  ;;  %4773 = vmatpush2.bf16.msra.mxu1 %v6439_v21  ;;  %v6396_v59 = vld [vmem:[#allocation10 + $0x728] ss:$12 sps:$4 sm:$0xff]   ;;  %v6401_v62 = vld [vmem:[#allocation10 + $0x710] ss:$12 sps:$4 sm:$0xff]  }
 0x2f6   :  { %v6770_v63 = vadd.f32 %v3188_v61, %v3146_v10  ;;  %v5560_v4 = vpop.f32.mrf.mxu0  ;;  %v6397_v61 = vld [vmem:[#allocation10 + $0x668] ss:$12 sps:$4 sm:$0xff]  }
 0x2f7   :  { %v3190_v3 = vpop.f32.mrf.mxu1  ;;  %v3230_v26 = vadd.f32 %v5559_v1, %v6759_v5  ;;  %v6442_v5 = vld [vmem:[#allocation10 + $0x8f0] ss:$12 sps:$4 sm:$0xff]  }
 0x2f8   :  { %v6773_v9 = vadd.f32 %v3190_v3, %v3148_v42  ;;  %v5561_v12 = vpop.f32.mrf.mxu0  ;;  %5607 = vmatprep.subr.bf16.mxu1 %v6442_v5  ;;  %v6402_v1 = vld [vmem:[#allocation10 + $0x650] ss:$12 sps:$4 sm:$0xff]   ;;  %v6407_v3 = vld [vmem:[#allocation10 + $0x638] ss:$12 sps:$4 sm:$0xff]  }
 0x2f9   :  { %v3192_v11 = vpop.f32.mrf.mxu1  ;;  %v5562_v18 = vadd.f32 %v5561_v12, %v5560_v4  ;;  %v6411_v4 = vld [vmem:[#allocation10 + $0x6e0] ss:$12 sps:$4 sm:$0xff]  }
 0x2fa   :  { %v6775_v16 = vadd.f32 %v3192_v11, %v3150_v51  ;;  %v6417_v11 = vld [vmem:[#allocation10 + $0x608] ss:$12 sps:$4 sm:$0xff]  }
 0x2fb   :  { %v3233_v20 = vadd.f32 %v5562_v18, %v6762_v17  ;;  %v3390_v18 = vrot.slane %v3373_v33, %v6693_v45  ;;  %v6443_v33 = vld [vmem:[#allocation10 + $0x830] ss:$12 sps:$4 sm:$0xff]  }
 0x313   :  { %v5579_v23 = vpop.f32.mrf.mxu1 }
 0x315   :  { %v5580_v24 = vpop.f32.mrf.mxu1 }
 0x316   :  { %v5581_v25 = vadd.f32 %v5580_v24, %v5579_v23 }
 0x317   :  { %v5582_v28 = vpop.f32.mrf.mxu1 }
 0x318   :  { %v6778_v48 = vadd.f32 %v5581_v25, %v3230_v26  ;;  %v6416_v26 = vld [vmem:[#allocation10 + $0x6c8] ss:$12 sps:$4 sm:$0xff]  }
 0x319   :  { %v5583_v30 = vpop.f32.mrf.mxu1 }
 0x31a   :  { %v5584_v31 = vadd.f32 %v5583_v30, %v5582_v28 }
 0x31c   :  { %v6780_v32 = vadd.f32 %v5584_v31, %v3233_v20 }
 0x332   :  { %v3909_v34 = vpop.f32.mrf.mxu0 }
 0x333   :  { %v3952_v17 = vpop.f32.mrf.mxu1  ;;  %v3910_v41 = vadd.f32 %v3909_v34, %v3378_v37 }
 0x334   :  { %v3911_v36 = vpop.f32.mrf.mxu0 }
 0x335   :  { %v3954_v35 = vpop.f32.mrf.mxu1  ;;  %v3912_v47 = vadd.f32 %v3911_v36, %v3382_v8  ;;  %v3953_v51 = vadd.f32 %v3952_v17, %v3910_v41 }
 0x336   :  { %v3913_v39 = vpop.f32.mrf.mxu0 }
 0x337   :  { %v3956_v10 = vpop.f32.mrf.mxu1  ;;  %v3914_v40 = vadd.f32 %v3913_v39, %v3378_v37  ;;  %v3955_v46 = vadd.f32 %v3954_v35, %v3912_v47  ;;  %v4047_v55 = vmax.f32 %v3953_v51, 0.0  ;;  %v6450_v51 = vld [vmem:[#allocation10 + $0x890] ss:$12 sps:$4 sm:$0xff]  }
 0x338   :  { %v3915_v42 = vpop.f32.mrf.mxu0 }
 0x339   :  { %v3957_v49 = vadd.f32 %v3956_v10, %v3914_v40  ;;  %v3916_v50 = vadd.f32 %v3915_v42, %v3382_v8  ;;  %v3958_v52 = vpop.f32.mrf.mxu1  ;;  %v4048_v53 = vmax.f32 %v3955_v46, 0.0  ;;  %v6444_v10 = vld [vmem:[#allocation10 + $0x8d8] ss:$12 sps:$4 sm:$0xff]   ;;  %v6446_v42 = vld [vmem:[#allocation10 + $0x8c0] ss:$12 sps:$4 sm:$0xff]  }
 0x33a   :  { %v6445_v40 = vld [vmem:[#allocation10 + $0x818] ss:$12 sps:$4 sm:$0xff]   ;;  %v6447_v46 = vld [vmem:[#allocation10 + $0x800] ss:$12 sps:$4 sm:$0xff]  }
 0x33b   :  { %v3959_v14 = vadd.f32 %v3958_v52, %v3916_v50  ;;  %v4051_v43 = vmax.f32 %v3957_v49, 0.0  ;;  %v6448_v49 = vld [vmem:[#allocation10 + $0x8a8] ss:$12 sps:$4 sm:$0xff]   ;;  %v6451_v52 = vld [vmem:[#allocation10 + $0x7d0] ss:$12 sps:$4 sm:$0xff]  }
 0x33c   :  { %v6449_v50 = vld [vmem:[#allocation10 + $0x7e8] ss:$12 sps:$4 sm:$0xff]  }
 0x33d   :  { %v4052_v29 = vmax.f32 %v3959_v14, 0.0  ;;  %v4055_v54 = vpack.c.bf16 %v4051_v43, %v4047_v55  ;;  %v6452_v14 = vld [vmem:[#allocation10 + $0x878] ss:$12 sps:$4 sm:$0xff]   ;;  %v6456_v55 = vld [vmem:[#allocation10 + $0x848] ss:$12 sps:$4 sm:$0xff]  }
 0x33e   :  { %v6453_v43 = vld [vmem:[#allocation10 + $0x7b8] ss:$12 sps:$4 sm:$0xff]  }
 0x33f   :  { %v4056_v0 = vpack.c.bf16 %v4052_v29, %v4048_v53  ;;  %v6454_v53 = vld [vmem:[#allocation10 + $0x860] ss:$12 sps:$4 sm:$0xff]  }
 0x340   :  { %v6455_v29 = vld [vmem:[#allocation10 + $0x7a0] ss:$12 sps:$4 sm:$0xff]  }
 0x341   :  { %4731 = vmatprep.mubr.bf16.mxu0 %v4056_v0 }
 0x342   :  { %4732 = vmatmul.mubr.bf16.vlgmr.msra.gmra.mxu0 %v4055_v54 }
 0x343   :  { %5586 = vmatpush3.bf16.msra.mxu0 %v6382_v27  ;;  %4817 = vmatprep.mubr.bf16.mxu0 %v4056_v0  ;;  %v6457_v0 = vld [vmem:[#allocation10 + $0x788] ss:$12 sps:$4 sm:$0xff]  }
 0x344   :  { %5587 = vmatprep.subr.bf16.mxu0 %v6386_v38  ;;  %v4873_v38 = vld [vmem:[#allocation12] sm:$0x7] }
 0x347   :  { %5588 = vmatpush3.bf16.msra.mxu0 %v6387_v56 }
 0x348   :  { %5589 = vmatprep.subr.bf16.mxu0 %v6391_v57 }
 0x34b   :  { %5590 = vmatpush3.bf16.msra.mxu0 %v6392_v58  ;;  %v4878_v58 = vrot.slane %v4873_v38, %v6679_v15 }
 0x34c   :  { %5591 = vmatprep.subr.bf16.mxu0 %v6396_v59 }
 0x34f   :  { %5592 = vmatpush3.bf16.msra.mxu0 %v6397_v61 }
 0x350   :  { %5593 = vmatprep.subr.bf16.mxu0 %v6401_v62 }
 0x352   :  { %v4038_v12 = vpop.f32.mrf.mxu0 }
 0x353   :  { %5594 = vmatpush3.bf16.msra.mxu0 %v6402_v1 }
 0x354   :  { %5595 = vmatprep.subr.bf16.mxu0 %v6406_v2  ;;  %v4040_v7 = vpop.f32.mrf.mxu0  ;;  %v4882_v2 = vrot.slane %v4873_v38, %v6708_v13 }
 0x356   :  { %v4042_v23 = vpop.f32.mrf.mxu0 }
 0x357   :  { %5596 = vmatpush3.bf16.msra.mxu0 %v6407_v3 }
 0x358   :  { %5597 = vmatprep.subr.bf16.mxu0 %v6411_v4  ;;  %v4044_v37 = vpop.f32.mrf.mxu0 }
 0x35b   :  { %5598 = vmatpush3.bf16.msra.mxu0 %v6412_v6 }
 0x35c   :  { %5599 = vmatprep.subr.bf16.mxu0 %v6416_v26 }
 0x35f   :  { %5600 = vmatpush3.bf16.msra.mxu0 %v6417_v11 }
 0x362   :  { %4818 = vmatmul.mubr.bf16.vlgmr.msra.gmra.mxu0 %v4055_v54 }
 0x373   :  { %v3995_v20 = vpop.f32.mrf.mxu1 }
 0x374   :  { %v3996_v5 = vadd.f32 %v3995_v20, %v3386_v19 }
 0x375   :  { %v3997_v21 = vpop.f32.mrf.mxu1 }
 0x376   :  { %v3998_v22 = vadd.f32 %v3997_v21, %v3390_v18  ;;  %v4039_v8 = vadd.f32 %v4038_v12, %v3996_v5 }
 0x377   :  { %v3999_v24 = vpop.f32.mrf.mxu1 }
 0x378   :  { %v4000_v25 = vadd.f32 %v3999_v24, %v3386_v19  ;;  %v4041_v30 = vadd.f32 %v4040_v7, %v3998_v22  ;;  %v4049_v47 = vmax.f32 %v4039_v8, 0.0 }
 0x379   :  { %v4001_v28 = vpop.f32.mrf.mxu1 }
 0x37a   :  { %v4043_v31 = vadd.f32 %v4042_v23, %v4000_v25  ;;  %v4002_v17 = vadd.f32 %v4001_v28, %v3390_v18  ;;  %v4050_v36 = vmax.f32 %v4041_v30, 0.0 }
 0x37c   :  { %v4045_v34 = vadd.f32 %v4044_v37, %v4002_v17  ;;  %v4053_v35 = vmax.f32 %v4043_v31, 0.0 }
 0x37e   :  { %v4054_v45 = vmax.f32 %v4045_v34, 0.0  ;;  %v4057_v39 = vpack.c.bf16 %v4053_v35, %v4049_v47 }
 0x380   :  { %v4058_v41 = vpack.c.bf16 %v4054_v45, %v4050_v36 }
 0x382   :  { %4774 = vmatprep.mubr.bf16.mxu1 %v4058_v41 }
 0x383   :  { %4775 = vmatmul.mubr.bf16.vlgmr.msra.gmra.mxu1 %v4057_v39 }
 0x384   :  { %5608 = vmatpush3.bf16.msra.mxu1 %v6443_v33  ;;  %4858 = vmatprep.mubr.bf16.mxu1 %v4058_v41 }
 0x385   :  { %5609 = vmatprep.subr.bf16.mxu1 %v6444_v10 }
 0x388   :  { %5610 = vmatpush3.bf16.msra.mxu1 %v6445_v40 }
 0x389   :  { %5611 = vmatprep.subr.bf16.mxu1 %v6446_v42 }
 0x38c   :  { %5612 = vmatpush3.bf16.msra.mxu1 %v6447_v46 }
 0x38d   :  { %5613 = vmatprep.subr.bf16.mxu1 %v6448_v49 }
 0x390   :  { %5614 = vmatpush3.bf16.msra.mxu1 %v6449_v50 }
 0x391   :  { %5615 = vmatprep.subr.bf16.mxu1 %v6450_v51 }
 0x394   :  { %5616 = vmatpush3.bf16.msra.mxu1 %v6451_v52 }
 0x395   :  { %5617 = vmatprep.subr.bf16.mxu1 %v6452_v14 }
 0x398   :  { %5618 = vmatpush3.bf16.msra.mxu1 %v6453_v43 }
 0x399   :  { %5619 = vmatprep.subr.bf16.mxu1 %v6454_v53 }
 0x39c   :  { %5620 = vmatpush3.bf16.msra.mxu1 %v6455_v29 }
 0x39d   :  { %5621 = vmatprep.subr.bf16.mxu1 %v6456_v55 }
 0x3a0   :  { %5622 = vmatpush3.bf16.msra.mxu1 %v6457_v0 }
 0x3a3   :  { %4859 = vmatmul.mubr.bf16.vlgmr.msra.gmra.mxu1 %v4057_v39 }
 0x402   :  { %v4733_v27 = vpop.f32.mrf.mxu0 }
 0x404   :  { %v4735_v54 = vpop.f32.mrf.mxu0 }
 0x406   :  { %v4737_v59 = vpop.f32.mrf.mxu0 }
 0x408   :  { %v4739_v11 = vpop.f32.mrf.mxu0 }
 0x422   :  { %v5601_v13 = vpop.f32.mrf.mxu0 }
 0x424   :  { %v5602_v21 = vpop.f32.mrf.mxu0 }
 0x425   :  { %v5603_v23 = vadd.f32 %v5602_v21, %v5601_v13 }
 0x426   :  { %v5604_v22 = vpop.f32.mrf.mxu0 }
 0x428   :  { %v5605_v25 = vpop.f32.mrf.mxu0 }
 0x429   :  { %v5606_v17 = vadd.f32 %v5605_v25, %v5604_v22 }
 0x443   :  { %v4776_v56 = vpop.f32.mrf.mxu1 }
 0x444   :  { %v4777_v57 = vadd.f32 %v4776_v56, %v4733_v27 }
 0x445   :  { %v4778_v61 = vpop.f32.mrf.mxu1 }
 0x446   :  { %v4867_v62 = vadd.f32 %v4777_v57, %v6768_v60  ;;  %v4779_v1 = vadd.f32 %v4778_v61, %v4735_v54 }
 0x447   :  { %v4780_v3 = vpop.f32.mrf.mxu1 }
 0x448   :  { %v4890_v4 = vadd.f32 %v4878_v58, %v4867_v62  ;;  %v4868_v6 = vadd.f32 %v4779_v1, %v6770_v63  ;;  %v4781_v26 = vadd.f32 %v4780_v3, %v4737_v59 }
 0x449   :  { %v4782_v12 = vpop.f32.mrf.mxu1 }
 0x44a   :  { %4896 = vst [vmem:[#allocation13] sm:$0xff] %v4890_v4  ;;  %v4891_v18 = vadd.f32 %v4882_v2, %v4868_v6  ;;  %v4870_v7 = vadd.f32 %v4781_v26, %v6773_v9  ;;  %v4783_v19 = vadd.f32 %v4782_v12, %v4739_v11  ;;  %v4886_v9 = vrot.slane %v4873_v38, %v6690_v44 }
 0x44c   :  { %4897 = vst [vmem:[#allocation13 + $0x8] sm:$0xff] %v4891_v18  ;;  %v4893_v15 = vadd.f32 %v4878_v58, %v4870_v7  ;;  %v4871_v20 = vadd.f32 %v4783_v19, %v6775_v16 }
 0x44e   :  { %4899 = vst [vmem:[#allocation13 + $0x18] sm:$0xff] %v4893_v15  ;;  %v4894_v60 = vadd.f32 %v4882_v2, %v4871_v20 }
 0x450   :  { %4900 = vst [vmem:[#allocation13 + $0x20] sm:$0xff] %v4894_v60 }
 0x463   :  { %v5623_v5 = vpop.f32.mrf.mxu1 }
 0x465   :  { %v5624_v63 = vpop.f32.mrf.mxu1 }
 0x466   :  { %v5625_v24 = vadd.f32 %v5624_v63, %v5623_v5 }
 0x467   :  { %v5626_v28 = vpop.f32.mrf.mxu1 }
 0x468   :  { %v4861_v30 = vadd.f32 %v5625_v24, %v5603_v23 }
 0x469   :  { %v5627_v31 = vpop.f32.mrf.mxu1 }
 0x46a   :  { %v4869_v8 = vadd.f32 %v4861_v30, %v6778_v48  ;;  %v5628_v16 = vadd.f32 %v5627_v31, %v5626_v28 }
 0x46c   :  { %v4892_v37 = vadd.f32 %v4886_v9, %v4869_v8  ;;  %v4864_v34 = vadd.f32 %v5628_v16, %v5606_v17 }
 0x46e   :  { %4898 = vst [vmem:[#allocation13 + $0x10] sm:$0xff] %v4892_v37  ;;  %v4872_v35 = vadd.f32 %v4864_v34, %v6780_v32 }
 0x470   :  { %v4895_v36 = vadd.f32 %v4886_v9, %v4872_v35 }
 0x472   :  { %4901 = vst [vmem:[#allocation13 + $0x28] sm:$0xff] %v4895_v36 }
 0x473   :  { %6569 = shalt.err (!%p6566_p1)
}
 0x474   :  { %4913 = dma.vmem_to_hbm [thread:$0]  %s4908_s5, 768, %s6807_s6, [#allocation6], %s6593_s12, %s6593_s12, %s6594_s13  }
 0x475   :  { %6584 = dma.done.wait [#allocation6], 768  }
 0x476   :  { %6585 = vsyncadd [#allocation6], 4294966528 }
 0x477   :  { %4917 = vsyncpa [#allocation5], 1 }
 0x478   :  { %4918 = vsyncpa [#allocation8], 1 }
 0x479   :  { %4919 = vsyncpa [#allocation11], 1 }
 0x47a   :  { %4920 = vsyncpa [#allocation6], 1 }

</bundles_post_ra>
